<compile_context>
chip_gen: v7x
topology: tpu7x:2x2x1
jax: 0.10.0
libtpu: 0.0.40
codegen_flags: <defaults>
</compile_context>

<pallas_src>
import functools
import math

import jax
import jax.numpy as jnp
from jax import lax
from jax.experimental import pallas as pl
from jax.experimental.pallas import tpu as pltpu
import numpy as np


def _mlp_kernel(x_ref, *refs, compute_dtype):
    """refs = (w0T, b0, w1T, b1, ..., w_last, b_last, out_ref).

    Hidden weights arrive pre-transposed as (in_dim, out_dim).  The final
    Linear(hidden, 1) keeps its PyTorch (1, hidden) layout and is contracted
    against the activations' feature axis, producing a lane-dense
    (1, batch_tile) row that is stored directly.
    """
    out_ref = refs[-1]
    param_refs = refs[:-1]
    n_layers = len(param_refs) // 2

    h = x_ref[...]  # (batch_tile, d), float32
    for i in range(n_layers - 1):
        w = param_refs[2 * i][...]        # (in_dim, out_dim), compute_dtype
        b = param_refs[2 * i + 1][...]    # (1, out_dim), float32
        # compute_dtype (bf16 by default) operands into the MXU, f32 accumulate;
        # bias add + ReLU stay in f32 on the VPU.
        h = jnp.dot(h.astype(compute_dtype), w,
                    preferred_element_type=jnp.float32) + b
        h = jnp.maximum(h, 0.0)

    w_last = param_refs[-2][...]          # (1, hidden)  (PyTorch (out, in) layout)
    b_last = param_refs[-1][...]          # (1, 1), float32
    out_row = lax.dot_general(
        w_last, h.astype(compute_dtype),
        dimension_numbers=(((1,), (1,)), ((), ())),
        preferred_element_type=jnp.float32,
    ) + b_last                            # (1, batch_tile): lane-dense store
    out_ref[...] = out_row.astype(out_ref.dtype)


def _choose_batch_tile(batch):
    """Largest tile that keeps >=2 grid steps (both v7x TCs busy) and a
    lane-dense (multiple-of-128) output row whenever the batch allows it."""
    for t in (1024, 512, 256, 128):
        if batch >= 2 * t:
            return t
    if batch >= 128:
        return 128
    return max(8, ((batch + 7) // 8) * 8)   # tiny batches: one sublane-aligned tile


def _param_spec(shape, single_buffer):
    index_map = lambda i: (0,) * len(shape)
    if single_buffer:
        # Parameter block index never changes across grid steps -> one VMEM copy.
        return pl.BlockSpec(shape, index_map,
                            pipeline_mode=pl.Buffered(buffer_count=1))
    return pl.BlockSpec(shape, index_map)


@functools.partial(
    jax.jit,
    static_argnames=("batch_tile", "compute_dtype", "single_buffer_params"))
def _deepnn_forward_impl(x, params, *, batch_tile, compute_dtype,
                         single_buffer_params):
    B, d = x.shape
    n_layers = len(params) // 2

    # ---- layout plumbing (outside the kernel, done by XLA once per call) ----
    prepared = []
    for i in range(n_layers - 1):
        w, b = params[2 * i], params[2 * i + 1]
        prepared.append(w.T.astype(compute_dtype))               # (in, out)
        prepared.append(jnp.reshape(b, (1, -1)).astype(jnp.float32))
    w_last, b_last = params[-2], params[-1]
    prepared.append(w_last.astype(compute_dtype))                # (1, hidden)
    prepared.append(jnp.reshape(b_last, (1, 1)).astype(jnp.float32))

    # Pad the batch so it divides into full tiles; padded rows are dropped below.
    n_tiles = (B + batch_tile - 1) // batch_tile
    B_pad = n_tiles * batch_tile
    if B_pad != B:
        x = jnp.pad(x, ((0, B_pad - B), (0, 0)))

    # ---- VMEM budget (kept under ~48 MiB so it is safe on v7x's 64 MiB) ----
    param_bytes = sum(math.prod(p.shape) * p.dtype.itemsize for p in prepared)
    widths = [d] + [params[2 * i].shape[0] for i in range(n_layers)]
    act_bytes = 4 * batch_tile * max(widths)
    copies = 1 if single_buffer_params else 2
    est = (copies * param_bytes
           + 2 * (batch_tile * d * 4 + batch_tile * 4)
           + 4 * act_bytes
           + (1 << 20))
    vmem_limit = int(min(max(est, 32 << 20), 48 << 20))
    # TODO(synk): if the parameters alone exceed this budget (very large
    # hidden_size/depth), switch weights to memory_space=pl.ANY and stream them
    # per layer with manual make_async_copy double-buffering.

    in_specs = [pl.BlockSpec((batch_tile, d), lambda i: (i, 0))]
    for p in prepared:
        in_specs.append(_param_spec(p.shape, single_buffer_params))
    out_specs = pl.BlockSpec((1, batch_tile), lambda i: (0, i))

    out = pl.pallas_call(
        functools.partial(_mlp_kernel, compute_dtype=compute_dtype),
        out_shape=jax.ShapeDtypeStruct((1, B_pad), jnp.float32),
        grid_spec=pltpu.PrefetchScalarGridSpec(
            num_scalar_prefetch=0,
            grid=(n_tiles,),
            in_specs=in_specs,
            out_specs=out_specs,
        ),
        compiler_params=pltpu.CompilerParams(
            dimension_semantics=("parallel",),
            vmem_limit_bytes=vmem_limit,
        ),
    )(x, *prepared)

    # torch: network(x).squeeze()  (shape (B,) for B > 1; for B == 1 torch would
    # also drop the batch dim and return a scalar)
    return out[0, :B]


def deepnn_forward(x, params, *, batch_tile=None, compute_dtype=jnp.bfloat16):
    """Pallas forward of DeepNN: returns network(x).squeeze() -> shape (B,)."""
    if batch_tile is None:
        batch_tile = _choose_batch_tile(x.shape[0])
    params = tuple(params)
    try:
        return _deepnn_forward_impl(
            x, params, batch_tile=batch_tile, compute_dtype=compute_dtype,
            single_buffer_params=True)
    except Exception:
        # This jax version rejects pipeline_mode=pl.Buffered(1) on the top-level
        # pipeline; fall back to default (double-buffered) parameter blocks.
        return _deepnn_forward_impl(
            x, params, batch_tile=batch_tile, compute_dtype=compute_dtype,
            single_buffer_params=False)


def init_deepnn_params(key, d, hidden_size, depth, mode="special"):
    """Deterministic init matching DeepNN.__init__ ('special' mode):
    hidden Linear weights ~ N(0, (sqrt(2)/sqrt(fan_in))^2), zero biases,
    final Linear weight ~ N(0, 0.01^2), zero bias.  PyTorch (out, in) layout."""
    params = []
    prev_dim = d
    for _ in range(depth):
        key, sub = jax.random.split(key)
        if mode == "special":
            std = np.sqrt(2.0) / np.sqrt(prev_dim)  # calculate_gain('relu')/sqrt(fan_in)
        else:
            std = 1.0 / np.sqrt(prev_dim)
        w = std * jax.random.normal(sub, (hidden_size, prev_dim), dtype=jnp.float32)
        b = jnp.zeros((1, hidden_size), dtype=jnp.float32)
        params.extend([w, b])
        prev_dim = hidden_size
    key, sub = jax.random.split(key)
    final_std = 0.01 if mode == "special" else 1.0 / np.sqrt(prev_dim)
    w_final = final_std * jax.random.normal(sub, (1, prev_dim), dtype=jnp.float32)
    b_final = jnp.zeros((1, 1), dtype=jnp.float32)
    params.extend([w_final, b_final])
    return params


def deepnn_reference(x, params):
    """Plain-JAX (float32) reference for correctness checking."""
    h = x
    n_layers = len(params) // 2
    for i in range(n_layers):
        w, b = params[2 * i], params[2 * i + 1]
        h = h @ w.T + jnp.reshape(b, (1, -1))
        if i < n_layers - 1:
            h = jnp.maximum(h, 0.0)
    return h[:, 0]


if __name__ == "__main__":
    d = 8
    hidden_size = 32
    depth = 3
    batch = 256  # -> batch_tile = 128, 2 parallel grid steps

    key = jax.random.PRNGKey(0)
    key_x, key_p = jax.random.split(key)

    x = jax.random.normal(key_x, (batch, d), dtype=jnp.float32)
    params = init_deepnn_params(key_p, d, hidden_size, depth, mode="special")

    y_ref = deepnn_reference(x, params)

    # float32 compute path: tight check against the plain-JAX reference.
    y_f32 = jax.block_until_ready(
        deepnn_forward(x, params, compute_dtype=jnp.float32))
    np.testing.assert_allclose(np.asarray(y_f32), np.asarray(y_ref),
                               rtol=1e-4, atol=1e-5)

    # default bf16-matmul / f32-accumulate path (MXU-friendly on v5e/v6e/v7x).
    y_bf16 = jax.block_until_ready(deepnn_forward(x, params))
    np.testing.assert_allclose(np.asarray(y_bf16), np.asarray(y_ref),
                               rtol=5e-2, atol=2e-2)

    assert y_f32.shape == (batch,) and y_bf16.shape == (batch,)
    print("KERNEL_OK")
</pallas_src>

<mosaic_0001>
module attributes {stable_mosaic.version = 11 : i64} {
  func.func @_mlp_kernel(%arg0: i32, %arg1: memref<128x8xf32, #tpu.memory_space<vmem>>, %arg2: memref<8x32xf32, #tpu.memory_space<vmem>>, %arg3: memref<1x32xf32, #tpu.memory_space<vmem>>, %arg4: memref<32x32xf32, #tpu.memory_space<vmem>>, %arg5: memref<1x32xf32, #tpu.memory_space<vmem>>, %arg6: memref<32x32xf32, #tpu.memory_space<vmem>>, %arg7: memref<1x32xf32, #tpu.memory_space<vmem>>, %arg8: memref<1x32xf32, #tpu.memory_space<vmem>>, %arg9: memref<1x1xf32, #tpu.memory_space<vmem>>, %arg10: memref<1x128xf32, #tpu.memory_space<vmem>>) attributes {dimension_semantics = [#tpu.dimension_semantics<parallel>], iteration_bounds = array<i64: 2>, scalar_prefetch = 0 : i64, scratch_operands = 0 : i64, tpu.core_type = #tpu.core_type<tc>, window_params = [{transform_indices = @transform_0, window_bounds = array<i64: 128, 8>}, {pipeline_mode = #tpu.pipeline_mode<synchronous>, transform_indices = @transform_1, window_bounds = array<i64: 8, 32>}, {pipeline_mode = #tpu.pipeline_mode<synchronous>, transform_indices = @transform_2, window_bounds = array<i64: 1, 32>}, {pipeline_mode = #tpu.pipeline_mode<synchronous>, transform_indices = @transform_3, window_bounds = array<i64: 32, 32>}, {pipeline_mode = #tpu.pipeline_mode<synchronous>, transform_indices = @transform_4, window_bounds = array<i64: 1, 32>}, {pipeline_mode = #tpu.pipeline_mode<synchronous>, transform_indices = @transform_5, window_bounds = array<i64: 32, 32>}, {pipeline_mode = #tpu.pipeline_mode<synchronous>, transform_indices = @transform_6, window_bounds = array<i64: 1, 32>}, {pipeline_mode = #tpu.pipeline_mode<synchronous>, transform_indices = @transform_7, window_bounds = array<i64: 1, 32>}, {pipeline_mode = #tpu.pipeline_mode<synchronous>, transform_indices = @transform_8, window_bounds = array<i64: 1, 1>}, {transform_indices = @transform_9, window_bounds = array<i64: 1, 128>}]} {
    %c0 = arith.constant 0 : index
    %c0_0 = arith.constant 0 : index
    %0 = vector.load %arg1[%c0, %c0_0] : memref<128x8xf32, #tpu.memory_space<vmem>>, vector<128x8xf32>
    %c0_1 = arith.constant 0 : index
    %c0_2 = arith.constant 0 : index
    %1 = vector.load %arg2[%c0_1, %c0_2] : memref<8x32xf32, #tpu.memory_space<vmem>>, vector<8x32xf32>
    %c0_3 = arith.constant 0 : index
    %c0_4 = arith.constant 0 : index
    %2 = vector.load %arg3[%c0_3, %c0_4] : memref<1x32xf32, #tpu.memory_space<vmem>>, vector<1x32xf32>
    %cst = arith.constant dense<0.000000e+00> : vector<128x32xf32>
    %3 = tpu.matmul %0, %1, %cst {dimension_numbers = #tpu.dot_dimension_numbers<[1], [0], [0], [1], [0, 0, 1, 1], [], []>} : vector<128x8xf32>, vector<8x32xf32>, vector<128x32xf32> -> vector<128x32xf32>
    %4 = vector.broadcast %2 : vector<1x32xf32> to vector<128x32xf32>
    %5 = arith.addf %3, %4 : vector<128x32xf32>
    %cst_5 = arith.constant 0.000000e+00 : f32
    %6 = vector.broadcast %cst_5 : f32 to vector<128x32xf32>
    %7 = arith.maximumf %5, %6 : vector<128x32xf32>
    %c0_6 = arith.constant 0 : index
    %c0_7 = arith.constant 0 : index
    %8 = vector.load %arg4[%c0_6, %c0_7] : memref<32x32xf32, #tpu.memory_space<vmem>>, vector<32x32xf32>
    %c0_8 = arith.constant 0 : index
    %c0_9 = arith.constant 0 : index
    %9 = vector.load %arg5[%c0_8, %c0_9] : memref<1x32xf32, #tpu.memory_space<vmem>>, vector<1x32xf32>
    %cst_10 = arith.constant dense<0.000000e+00> : vector<128x32xf32>
    %10 = tpu.matmul %7, %8, %cst_10 {dimension_numbers = #tpu.dot_dimension_numbers<[1], [0], [0], [1], [0, 0, 1, 1], [], []>} : vector<128x32xf32>, vector<32x32xf32>, vector<128x32xf32> -> vector<128x32xf32>
    %11 = vector.broadcast %9 : vector<1x32xf32> to vector<128x32xf32>
    %12 = arith.addf %10, %11 : vector<128x32xf32>
    %cst_11 = arith.constant 0.000000e+00 : f32
    %13 = vector.broadcast %cst_11 : f32 to vector<128x32xf32>
    %14 = arith.maximumf %12, %13 : vector<128x32xf32>
    %c0_12 = arith.constant 0 : index
    %c0_13 = arith.constant 0 : index
    %15 = vector.load %arg6[%c0_12, %c0_13] : memref<32x32xf32, #tpu.memory_space<vmem>>, vector<32x32xf32>
    %c0_14 = arith.constant 0 : index
    %c0_15 = arith.constant 0 : index
    %16 = vector.load %arg7[%c0_14, %c0_15] : memref<1x32xf32, #tpu.memory_space<vmem>>, vector<1x32xf32>
    %cst_16 = arith.constant dense<0.000000e+00> : vector<128x32xf32>
    %17 = tpu.matmul %14, %15, %cst_16 {dimension_numbers = #tpu.dot_dimension_numbers<[1], [0], [0], [1], [0, 0, 1, 1], [], []>} : vector<128x32xf32>, vector<32x32xf32>, vector<128x32xf32> -> vector<128x32xf32>
    %18 = vector.broadcast %16 : vector<1x32xf32> to vector<128x32xf32>
    %19 = arith.addf %17, %18 : vector<128x32xf32>
    %cst_17 = arith.constant 0.000000e+00 : f32
    %20 = vector.broadcast %cst_17 : f32 to vector<128x32xf32>
    %21 = arith.maximumf %19, %20 : vector<128x32xf32>
    %c0_18 = arith.constant 0 : index
    %c0_19 = arith.constant 0 : index
    %22 = vector.load %arg8[%c0_18, %c0_19] : memref<1x32xf32, #tpu.memory_space<vmem>>, vector<1x32xf32>
    %c0_20 = arith.constant 0 : index
    %c0_21 = arith.constant 0 : index
    %23 = vector.load %arg9[%c0_20, %c0_21] : memref<1x1xf32, #tpu.memory_space<vmem>>, vector<1x1xf32>
    %cst_22 = arith.constant dense<0.000000e+00> : vector<1x128xf32>
    %24 = tpu.matmul %22, %21, %cst_22 {dimension_numbers = #tpu.dot_dimension_numbers<[1], [1], [0], [0], [0, 0, 1, 0], [], []>} : vector<1x32xf32>, vector<128x32xf32>, vector<1x128xf32> -> vector<1x128xf32>
    %25 = vector.broadcast %23 : vector<1x1xf32> to vector<1x128xf32>
    %26 = arith.addf %24, %25 : vector<1x128xf32>
    %c0_23 = arith.constant 0 : index
    %c0_24 = arith.constant 0 : index
    %27 = vector.load %arg10[%c0_23, %c0_24] : memref<1x128xf32, #tpu.memory_space<vmem>>, vector<1x128xf32>
    tpu.vector_store %arg10[%c0_23, %c0_24], %26 {strides = array<i32>} : memref<1x128xf32, #tpu.memory_space<vmem>>, vector<1x128xf32>,
    return
  }
  func.func @transform_0(%arg0: i32) -> (i32, i32) {
    %c0_i32 = arith.constant 0 : i32
    %c0_i32_0 = arith.constant 0 : i32
    return %arg0, %c0_i32 : i32, i32
  }
  func.func @transform_1(%arg0: i32) -> (i32, i32) {
    %c0_i32 = arith.constant 0 : i32
    %c0_i32_0 = arith.constant 0 : i32
    %c0_i32_1 = arith.constant 0 : i32
    return %c0_i32, %c0_i32_0 : i32, i32
  }
  func.func @transform_2(%arg0: i32) -> (i32, i32) {
    %c0_i32 = arith.constant 0 : i32
    %c0_i32_0 = arith.constant 0 : i32
    %c0_i32_1 = arith.constant 0 : i32
    return %c0_i32, %c0_i32_0 : i32, i32
  }
  func.func @transform_3(%arg0: i32) -> (i32, i32) {
    %c0_i32 = arith.constant 0 : i32
    %c0_i32_0 = arith.constant 0 : i32
    %c0_i32_1 = arith.constant 0 : i32
    return %c0_i32, %c0_i32_0 : i32, i32
  }
  func.func @transform_4(%arg0: i32) -> (i32, i32) {
    %c0_i32 = arith.constant 0 : i32
    %c0_i32_0 = arith.constant 0 : i32
    %c0_i32_1 = arith.constant 0 : i32
    return %c0_i32, %c0_i32_0 : i32, i32
  }
  func.func @transform_5(%arg0: i32) -> (i32, i32) {
    %c0_i32 = arith.constant 0 : i32
    %c0_i32_0 = arith.constant 0 : i32
    %c0_i32_1 = arith.constant 0 : i32
    return %c0_i32, %c0_i32_0 : i32, i32
  }
  func.func @transform_6(%arg0: i32) -> (i32, i32) {
    %c0_i32 = arith.constant 0 : i32
    %c0_i32_0 = arith.constant 0 : i32
    %c0_i32_1 = arith.constant 0 : i32
    return %c0_i32, %c0_i32_0 : i32, i32
  }
  func.func @transform_7(%arg0: i32) -> (i32, i32) {
    %c0_i32 = arith.constant 0 : i32
    %c0_i32_0 = arith.constant 0 : i32
    %c0_i32_1 = arith.constant 0 : i32
    return %c0_i32, %c0_i32_0 : i32, i32
  }
  func.func @transform_8(%arg0: i32) -> (i32, i32) {
    %c0_i32 = arith.constant 0 : i32
    %c0_i32_0 = arith.constant 0 : i32
    %c0_i32_1 = arith.constant 0 : i32
    return %c0_i32, %c0_i32_0 : i32, i32
  }
  func.func @transform_9(%arg0: i32) -> (i32, i32) {
    %c0_i32 = arith.constant 0 : i32
    %c0_i32_0 = arith.constant 0 : i32
    return %c0_i32, %arg0 : i32, i32
  }
}

module attributes {stable_mosaic.version = 11 : i64} {
  func.func @_mlp_kernel(%arg0: i32, %arg1: memref<128x8xf32, #tpu.memory_space<vmem>>, %arg2: memref<8x32xf32, #tpu.memory_space<vmem>>, %arg3: memref<1x32xf32, #tpu.memory_space<vmem>>, %arg4: memref<32x32xf32, #tpu.memory_space<vmem>>, %arg5: memref<1x32xf32, #tpu.memory_space<vmem>>, %arg6: memref<32x32xf32, #tpu.memory_space<vmem>>, %arg7: memref<1x32xf32, #tpu.memory_space<vmem>>, %arg8: memref<1x32xf32, #tpu.memory_space<vmem>>, %arg9: memref<1x1xf32, #tpu.memory_space<vmem>>, %arg10: memref<1x128xf32, #tpu.memory_space<vmem>>) attributes {dimension_semantics = [#tpu.dimension_semantics<parallel>], iteration_bounds = array<i64: 2>, scalar_prefetch = 0 : i64, scratch_operands = 0 : i64, tpu.core_type = #tpu.core_type<tc>, window_params = [{transform_indices = @transform_0, window_bounds = array<i64: 128, 8>}, {pipeline_mode = #tpu.pipeline_mode<synchronous>, transform_indices = @transform_1, window_bounds = array<i64: 8, 32>}, {pipeline_mode = #tpu.pipeline_mode<synchronous>, transform_indices = @transform_2, window_bounds = array<i64: 1, 32>}, {pipeline_mode = #tpu.pipeline_mode<synchronous>, transform_indices = @transform_3, window_bounds = array<i64: 32, 32>}, {pipeline_mode = #tpu.pipeline_mode<synchronous>, transform_indices = @transform_4, window_bounds = array<i64: 1, 32>}, {pipeline_mode = #tpu.pipeline_mode<synchronous>, transform_indices = @transform_5, window_bounds = array<i64: 32, 32>}, {pipeline_mode = #tpu.pipeline_mode<synchronous>, transform_indices = @transform_6, window_bounds = array<i64: 1, 32>}, {pipeline_mode = #tpu.pipeline_mode<synchronous>, transform_indices = @transform_7, window_bounds = array<i64: 1, 32>}, {pipeline_mode = #tpu.pipeline_mode<synchronous>, transform_indices = @transform_8, window_bounds = array<i64: 1, 1>}, {transform_indices = @transform_9, window_bounds = array<i64: 1, 128>}]} {
    %c0 = arith.constant 0 : index
    %c0_0 = arith.constant 0 : index
    %0 = vector.load %arg1[%c0, %c0_0] : memref<128x8xf32, #tpu.memory_space<vmem>>, vector<128x8xf32>
    %c0_1 = arith.constant 0 : index
    %c0_2 = arith.constant 0 : index
    %1 = vector.load %arg2[%c0_1, %c0_2] : memref<8x32xf32, #tpu.memory_space<vmem>>, vector<8x32xf32>
    %c0_3 = arith.constant 0 : index
    %c0_4 = arith.constant 0 : index
    %2 = vector.load %arg3[%c0_3, %c0_4] : memref<1x32xf32, #tpu.memory_space<vmem>>, vector<1x32xf32>
    %cst = arith.constant dense<0.000000e+00> : vector<128x32xf32>
    %3 = tpu.matmul %0, %1, %cst {dimension_numbers = #tpu.dot_dimension_numbers<[1], [0], [0], [1], [0, 0, 1, 1], [], []>} : vector<128x8xf32>, vector<8x32xf32>, vector<128x32xf32> -> vector<128x32xf32>
    %4 = vector.broadcast %2 : vector<1x32xf32> to vector<128x32xf32>
    %5 = arith.addf %3, %4 : vector<128x32xf32>
    %cst_5 = arith.constant 0.000000e+00 : f32
    %6 = vector.broadcast %cst_5 : f32 to vector<128x32xf32>
    %7 = arith.maximumf %5, %6 : vector<128x32xf32>
    %c0_6 = arith.constant 0 : index
    %c0_7 = arith.constant 0 : index
    %8 = vector.load %arg4[%c0_6, %c0_7] : memref<32x32xf32, #tpu.memory_space<vmem>>, vector<32x32xf32>
    %c0_8 = arith.constant 0 : index
    %c0_9 = arith.constant 0 : index
    %9 = vector.load %arg5[%c0_8, %c0_9] : memref<1x32xf32, #tpu.memory_space<vmem>>, vector<1x32xf32>
    %cst_10 = arith.constant dense<0.000000e+00> : vector<128x32xf32>
    %10 = tpu.matmul %7, %8, %cst_10 {dimension_numbers = #tpu.dot_dimension_numbers<[1], [0], [0], [1], [0, 0, 1, 1], [], []>} : vector<128x32xf32>, vector<32x32xf32>, vector<128x32xf32> -> vector<128x32xf32>
    %11 = vector.broadcast %9 : vector<1x32xf32> to vector<128x32xf32>
    %12 = arith.addf %10, %11 : vector<128x32xf32>
    %cst_11 = arith.constant 0.000000e+00 : f32
    %13 = vector.broadcast %cst_11 : f32 to vector<128x32xf32>
    %14 = arith.maximumf %12, %13 : vector<128x32xf32>
    %c0_12 = arith.constant 0 : index
    %c0_13 = arith.constant 0 : index
    %15 = vector.load %arg6[%c0_12, %c0_13] : memref<32x32xf32, #tpu.memory_space<vmem>>, vector<32x32xf32>
    %c0_14 = arith.constant 0 : index
    %c0_15 = arith.constant 0 : index
    %16 = vector.load %arg7[%c0_14, %c0_15] : memref<1x32xf32, #tpu.memory_space<vmem>>, vector<1x32xf32>
    %cst_16 = arith.constant dense<0.000000e+00> : vector<128x32xf32>
    %17 = tpu.matmul %14, %15, %cst_16 {dimension_numbers = #tpu.dot_dimension_numbers<[1], [0], [0], [1], [0, 0, 1, 1], [], []>} : vector<128x32xf32>, vector<32x32xf32>, vector<128x32xf32> -> vector<128x32xf32>
    %18 = vector.broadcast %16 : vector<1x32xf32> to vector<128x32xf32>
    %19 = arith.addf %17, %18 : vector<128x32xf32>
    %cst_17 = arith.constant 0.000000e+00 : f32
    %20 = vector.broadcast %cst_17 : f32 to vector<128x32xf32>
    %21 = arith.maximumf %19, %20 : vector<128x32xf32>
    %c0_18 = arith.constant 0 : index
    %c0_19 = arith.constant 0 : index
    %22 = vector.load %arg8[%c0_18, %c0_19] : memref<1x32xf32, #tpu.memory_space<vmem>>, vector<1x32xf32>
    %c0_20 = arith.constant 0 : index
    %c0_21 = arith.constant 0 : index
    %23 = vector.load %arg9[%c0_20, %c0_21] : memref<1x1xf32, #tpu.memory_space<vmem>>, vector<1x1xf32>
    %cst_22 = arith.constant dense<0.000000e+00> : vector<1x128xf32>
    %24 = tpu.matmul %22, %21, %cst_22 {dimension_numbers = #tpu.dot_dimension_numbers<[1], [1], [0], [0], [0, 0, 1, 0], [], []>} : vector<1x32xf32>, vector<128x32xf32>, vector<1x128xf32> -> vector<1x128xf32>
    %25 = vector.broadcast %23 : vector<1x1xf32> to vector<1x128xf32>
    %26 = arith.addf %24, %25 : vector<1x128xf32>
    %c0_23 = arith.constant 0 : index
    %c0_24 = arith.constant 0 : index
    %27 = vector.load %arg10[%c0_23, %c0_24] : memref<1x128xf32, #tpu.memory_space<vmem>>, vector<1x128xf32>
    tpu.vector_store %arg10[%c0_23, %c0_24], %26 {strides = array<i32>} : memref<1x128xf32, #tpu.memory_space<vmem>>, vector<1x128xf32>,
    return
  }
  func.func @transform_0(%arg0: i32) -> (i32, i32) {
    %c0_i32 = arith.constant 0 : i32
    %c0_i32_0 = arith.constant 0 : i32
    return %arg0, %c0_i32 : i32, i32
  }
  func.func @transform_1(%arg0: i32) -> (i32, i32) {
    %c0_i32 = arith.constant 0 : i32
    %c0_i32_0 = arith.constant 0 : i32
    %c0_i32_1 = arith.constant 0 : i32
    return %c0_i32, %c0_i32_0 : i32, i32
  }
  func.func @transform_2(%arg0: i32) -> (i32, i32) {
    %c0_i32 = arith.constant 0 : i32
    %c0_i32_0 = arith.constant 0 : i32
    %c0_i32_1 = arith.constant 0 : i32
    return %c0_i32, %c0_i32_0 : i32, i32
  }
  func.func @transform_3(%arg0: i32) -> (i32, i32) {
    %c0_i32 = arith.constant 0 : i32
    %c0_i32_0 = arith.constant 0 : i32
    %c0_i32_1 = arith.constant 0 : i32
    return %c0_i32, %c0_i32_0 : i32, i32
  }
  func.func @transform_4(%arg0: i32) -> (i32, i32) {
    %c0_i32 = arith.constant 0 : i32
    %c0_i32_0 = arith.constant 0 : i32
    %c0_i32_1 = arith.constant 0 : i32
    return %c0_i32, %c0_i32_0 : i32, i32
  }
  func.func @transform_5(%arg0: i32) -> (i32, i32) {
    %c0_i32 = arith.constant 0 : i32
    %c0_i32_0 = arith.constant 0 : i32
    %c0_i32_1 = arith.constant 0 : i32
    return %c0_i32, %c0_i32_0 : i32, i32
  }
  func.func @transform_6(%arg0: i32) -> (i32, i32) {
    %c0_i32 = arith.constant 0 : i32
    %c0_i32_0 = arith.constant 0 : i32
    %c0_i32_1 = arith.constant 0 : i32
    return %c0_i32, %c0_i32_0 : i32, i32
  }
  func.func @transform_7(%arg0: i32) -> (i32, i32) {
    %c0_i32 = arith.constant 0 : i32
    %c0_i32_0 = arith.constant 0 : i32
    %c0_i32_1 = arith.constant 0 : i32
    return %c0_i32, %c0_i32_0 : i32, i32
  }
  func.func @transform_8(%arg0: i32) -> (i32, i32) {
    %c0_i32 = arith.constant 0 : i32
    %c0_i32_0 = arith.constant 0 : i32
    %c0_i32_1 = arith.constant 0 : i32
    return %c0_i32, %c0_i32_0 : i32, i32
  }
  func.func @transform_9(%arg0: i32) -> (i32, i32) {
    %c0_i32 = arith.constant 0 : i32
    %c0_i32_0 = arith.constant 0 : i32
    return %c0_i32, %arg0 : i32, i32
  }
}

</mosaic_0001>

<bundles_post_ra>
// kernel: _deepnn_forward_impl.1
= control target key start
LH: loop header
LB: loop body
LE: loop exit
PB: predicated region body
PF: predicated region fallthrough
CT: control target
= control target key end

     0   :  { %s1935_s0 = inlined_call_operand.vmem [shape: f32[256,8], index: 0, kind: input, shape index: {}]   ;;  %s1936_s1 = inlined_call_operand.vmem [shape: f32[8,32], index: 1, kind: input, shape index: {}]   ;;  %s1937_s2 = inlined_call_operand.vmem [shape: f32[1,32], index: 2, kind: input, shape index: {}]   ;;  %s1938_s3 = inlined_call_operand.vmem [shape: f32[32,32], index: 3, kind: input, shape index: {}]   ;;  %s1939_s4 = inlined_call_operand.vmem [shape: f32[1,32], index: 4, kind: input, shape index: {}]   ;;  %s1940_s5 = inlined_call_operand.vmem [shape: f32[32,32], index: 5, kind: input, shape index: {}]   ;;  %s1941_s6 = inlined_call_operand.vmem [shape: f32[1,32], index: 6, kind: input, shape index: {}]   ;;  %s1942_s7 = inlined_call_operand.vmem [shape: f32[1,32], index: 7, kind: input, shape index: {}]   ;;  %s1943_s8 = inlined_call_operand.<no memory space> [shape: f32[1,1], index: 8, kind: input, shape index: {}]   ;;  %s1944_s9 = inlined_call_operand.hbm [shape: f32[1,256], index: 9, kind: output, shape index: {}]  }
   0x1   :  { %v14_v0 = vstv %s1943_s8 }
   0x2   :  { %15 = vst [vmem:[#allocation2] sm:$0x1] %v14_v0 }
   0x3   :  { %16 = vsyncpa [#allocation4], 0 }
   0x4   :  { %18 = vsyncpa [#allocation4 + $0x1], 0  ;;  %s1700_s11 = smov 0   ;;  %s1702_s12 = smov 0  }
   0x5   :  { %s1704_s13 = smov 0   ;;  %s1706_s14 = smov 0  }
   0x6 LB: > { %s1209_s8 = sadd.s32 4294967295, %s1640_s14   ;;  %s1210_s15 = sadd.s32 4294967294, %s1640_s14   ;;  %s1640_s14 = sphi %s1706_s14, %s1952_s14   ;;  %s1636_s13 = sphi %s1704_s13, %s1951_s13   ;;  %s1632_s12 = sphi %s1702_s12, %s1950_s12   ;;  %s1628_s11 = sphi %s1700_s11, %s1949_s11  }
   0x7   : > { %s1723_s16 = sadd.s32 1, %s1640_s14   ;;  %s225_s17 = sadd.s32 1, %s1636_s13 }
   0x8   : > { %s222_s18 = ssub.s32 %s1640_s14, %s1723_s16  ;;  %p235_p0 = scmp.ne.s32.totalorder %s1636_s13, %s1632_s12 }
   0x9   : > { %p223_p1 = scmp.eq.s32.totalorder %s222_s18, 0  ;;  %p236_p2 = scmp.eq.s32.totalorder %s1209_s8, 1 }
   0xa   : > { %p241_p3 = scmp.ne.s32.totalorder %s1632_s12, %s1628_s11  ;;  %p242_p4 = scmp.eq.s32.totalorder %s1210_s15, 1 }
   0xb   : > { %s1733_s19 = scalar_select %p223_p1, %s1636_s13, %s225_s17  }
   0xc   : > { %p1735_p5 = por %p236_p2, %p235_p0  ;;  %p1739_p6 = por %p242_p4, %p241_p3 }
   0xd   : > { %p1213_p7 = scmp.ge.s32.totalorder %s1640_s14, 1  ;;  %p293_p8 = scmp.lt.s32.totalorder %s1640_s14, 3 }
   0xf   : > { %p294_p9 = pnand %p1213_p7, %p293_p8 }
  0x10   : > { %v350_v1 = vld [vmem:[%s1936_s1] sm:$0xff] (!%p294_p9)  ;;  %s1748_s24 = sshll.u32 (!%p294_p9), %s1209_s8, 4  ;;  %v569_v3 = vld [vmem:[%s1938_s3 + $0x8] sm:$0xff] (!%p294_p9)  ;;  %vm358_vm0 = vcmask (!%p294_p9), 64512   ;;  %v570_v21 = vld [vmem:[%s1938_s3 + $0x10] sm:$0xff] (!%p294_p9)  ;;  %vm579_vm1 = vcmask (!%p294_p9), 261120  }
  0x11   : > { %297 = sbr.rel (%p294_p9) target bundleno = 976 (0x3d0), region = 56  ;;  %v568_v2 = vld [vmem:[%s1938_s3] sm:$0xff] (!%p294_p9)  ;;  %1361 = vmatprep.subr.mxu0 (!%p294_p9), %v350_v1  ;;  %p329_p10 = scmp.lt.s32.totalorder (!%p294_p9), %s1748_s24, 31  ;;  %v571_v22 = vld [vmem:[%s1938_s3 + $0x18] sm:$0xff] (!%p294_p9)  ;;  %v790_v25 = vld [vmem:[%s1940_s5 + $0x8] sm:$0xff] (!%p294_p9)  ;;  %vm1643_vm2 = vmmov (!%p294_p9), 0  }
  0x12   : > { %v1486_v4 = vpack.c.bf16 (!%p294_p9), %v569_v3, %v568_v2  ;;  %1362 = vmatpush3.msra.mxu0 (!%p294_p9), %v350_v1  ;;  %v1490_v23 = vpack.c.bf16 (!%p294_p9), %v571_v22, %v570_v21  ;;  %v789_v24 = vld [vmem:[%s1940_s5] sm:$0xff] (!%p294_p9)  ;;  %v791_v26 = vld [vmem:[%s1940_s5 + $0x10] sm:$0xff] (!%p294_p9)  ;;  %v792_v28 = vld [vmem:[%s1940_s5 + $0x18] sm:$0xff] (!%p294_p9)  ;;  %s326_s28 = sand.u32 (!%p294_p9), 1, %s1632_s12   ;;  %s1646_s22 = smov (!%p294_p9), [#allocation3]  }
  0x13   : > { %v1494_v27 = vpack.c.bf16 (!%p294_p9), %v790_v25, %v789_v24  ;;  %v1498_v29 = vpack.c.bf16 (!%p294_p9), %v792_v28, %v791_v26  ;;  %v1216_v30 = vld [vmem:[%s1937_s2] ss:$0 sm:$0xff] (!%p294_p9)  ;;  %vm1857_vm3 = vmpackc.low (!%p294_p9), %vm579_vm1, %vm579_vm1  ;;  %s1143_s17 = scalar_lea.sflag (!%p294_p9), [#allocation4], %s326_s28  ;;  %s1582_s23 = sshll.u32 (!%p294_p9), %s1646_s22, 4  ;;  %s1583_s23 = int_to_ptr.vmem [resolvable:$false] %s1582_s23 }
  0x14   : > { %1487 = vmatprep.subr.bf16.mxu1 (!%p294_p9), %v1486_v4  ;;  %s1584_s25 = scalar_lea.vmem (!%p294_p9), %s1583_s23, 32 }
  0x15   : > { %1489 = vmatpush3.bf16.msra.mxu1 (!%p294_p9), %v1486_v4  ;;  %1495 = vmatprep.subr.bf16.mxu0 (!%p294_p9), %v1494_v27 }
  0x16   : > { %1491 = vmatprep.subr.bf16.mxu1 (!%p294_p9), %v1490_v23 }
  0x18   : > { %s330_s29 = scalar_select %p329_p10, %s1748_s24, 31 }
  0x19   : > { %1493 = vmatpush3.bf16.msra.mxu1 %v1490_v23 }
  0x1a   : > { %s1215_s30 = sshll.u32 %s330_s29, 3  ;;  %s327_s29 = scalar_lea.vmem [#allocation3], %s326_s28 }
  0x1b   : > { %s1761_s15 = scalar_lea.vmem %s1935_s0, %s1215_s30  ;;  %s1155_s30 = sshll.u32 %s327_s29, 4  ;;  %s1895_s30 = int_to_ptr.vmem [resolvable:$true] %s1155_s30 }
  0x1c   : > { %v334_v5 = vld [vmem:[%s1761_s15] sm:$0xff]  ;;  %v335_v6 = vld [vmem:[%s1761_s15 + $0x8] sm:$0xff]  ;;  %v336_v7 = vld [vmem:[%s1761_s15 + $0x10] sm:$0xff]  ;;  %s1578_s18 = scalar_lea.vmem %s1895_s30, 16  ;;  %p1585_p0 = scmp.lt.s32.totalorder %s1895_s30, %s1583_s23 }
  0x1d   : > { %1363 = vmatprep.mubr.msk.f32.mxu0 %vm358_vm0, %v334_v5  ;;  %v337_v8 = vld [vmem:[%s1761_s15 + $0x18] sm:$0xff]  ;;  %v338_v9 = vld [vmem:[%s1761_s15 + $0x20] sm:$0xff]  ;;  %v339_v10 = vld [vmem:[%s1761_s15 + $0x28] sm:$0xff]  ;;  %p1579_p11 = scmp.ne.s32.totalorder %s1895_s30, %s1578_s18  ;;  %p1586_p1 = scmp.lt.s32.totalorder %s1584_s25, %s1578_s18 }
  0x1e   : > { %1364 = vmatmul.mubr.msk.f32.vlgmr.msra.gmra.mrb[0].mxu0 %vm358_vm0, %v335_v6  ;;  %v340_v11 = vld [vmem:[%s1761_s15 + $0x30] sm:$0xff]  ;;  %v341_v12 = vld [vmem:[%s1761_s15 + $0x38] sm:$0xff]  ;;  %v342_v13 = vld [vmem:[%s1761_s15 + $0x40] sm:$0xff] }
  0x1f   : > { %1366 = vmatprep.mubr.msk.f32.mxu0 %vm358_vm0, %v336_v7  ;;  %v343_v14 = vld [vmem:[%s1761_s15 + $0x48] sm:$0xff]  ;;  %v344_v15 = vld [vmem:[%s1761_s15 + $0x50] sm:$0xff]  ;;  %v345_v16 = vld [vmem:[%s1761_s15 + $0x58] sm:$0xff]  ;;  %1497 = vmatpush3.bf16.msra.mxu0 %v1494_v27  ;;  %p1580_p12 = pnand %p1579_p11, %p1735_p5  ;;  %p1587_p2 = por %p1586_p1, %p1585_p0 }
  0x20   : > { %v346_v17 = vld [vmem:[%s1761_s15 + $0x60] sm:$0xff]  ;;  %v347_v18 = vld [vmem:[%s1761_s15 + $0x68] sm:$0xff]  ;;  %v348_v19 = vld [vmem:[%s1761_s15 + $0x70] sm:$0xff]  ;;  %1499 = vmatprep.subr.bf16.mxu0 %v1498_v29 }
  0x21   : > { %v349_v20 = vld [vmem:[%s1761_s15 + $0x78] sm:$0xff]  ;;  %s1893_s15 = scalar_lea.hbm %s1944_s9, %s1748_s24  ;;  %p1581_p13 = pneg %p1580_p12 }
  0x22   : > { %1367 = vmatmul.mubr.msk.f32.gmra.mrb[2].mxu0 %vm358_vm0, %v337_v8 }
  0x23   : > { %1369 = vmatprep.mubr.msk.f32.mxu0 %vm358_vm0, %v338_v9  ;;  %1501 = vmatpush3.bf16.msra.mxu0 %v1498_v29  ;;  %p1588_p3 = pnand %p1587_p2, %p1581_p13 }
  0x26   : > { %1370 = vmatmul.mubr.msk.f32.gmra.mrb[4].mxu0 %vm358_vm0, %v339_v10 }
  0x27   : > { %1372 = vmatprep.mubr.msk.f32.mxu0 %vm358_vm0, %v340_v11 }
  0x2a   : > { %1373 = vmatmul.mubr.msk.f32.gmra.mrb[6].mxu0 %vm358_vm0, %v341_v12 }
  0x2b   : > { %1375 = vmatprep.mubr.msk.f32.mxu0 %vm358_vm0, %v342_v13 }
  0x2e   : > { %1376 = vmatmul.mubr.msk.f32.gmra.mrb[8].mxu0 %vm358_vm0, %v343_v14 }
  0x2f   : > { %1378 = vmatprep.mubr.msk.f32.mxu0 %vm358_vm0, %v344_v15  ;;  %v1233_v15 = vld [vmem:[%s1939_s4] ss:$0 sm:$0xff] }
  0x32   : > { %1379 = vmatmul.mubr.msk.f32.gmra.mrb[10].mxu0 %vm358_vm0, %v345_v16 }
  0x33   : > { %1381 = vmatprep.mubr.msk.f32.mxu0 %vm358_vm0, %v346_v17 }
  0x36   : > { %1382 = vmatmul.mubr.msk.f32.gmra.mrb[12].mxu0 %vm358_vm0, %v347_v18 }
  0x37   : > { %1384 = vmatprep.mubr.msk.f32.mxu0 %vm358_vm0, %v348_v19 }
  0x3a   : > { %1385 = vmatmul.mubr.msk.f32.gmra.mrb[14].mxu0 %vm358_vm0, %v349_v20 }
  0xf1   : > { %v1365_v31 = vpop.f32.mrb[0].mxu0 }
  0xf2   : > { %v479_v32 = vadd.f32 %v1365_v31, %v1216_v30  ;;  %v473_v33 = vpop.f32.mrb[1].mxu0 }
  0xf3   : > { %v474_v34 = vadd.f32 %v1216_v30, %v473_v33 }
  0xf4   : > { %v553_v37 = vmax.f32 %v479_v32, 0.0 }
  0xf5   : > { %v552_v35 = vmax.f32 %v474_v34, 0.0  ;;  %v1368_v36 = vpop.f32.mrb[2].mxu0 }
  0xf6   : > { %v489_v38 = vadd.f32 %v1368_v36, %v1216_v30  ;;  %v483_v39 = vpop.f32.mrb[3].mxu0 }
  0xf7   : > { %v484_v40 = vadd.f32 %v1216_v30, %v483_v39  ;;  %1395 = vmatprep.mubr.msk.f32.mxu1 %vm579_vm1, %v552_v35 }
  0xf8   : > { %v555_v41 = vmax.f32 %v489_v38, 0.0  ;;  %1396 = vmatmul.mubr.msk.f32.vlgmr.msra.gmra.mrb[0].mxu1 %vm579_vm1, %v553_v37 }
  0xf9   : > { %v554_v42 = vmax.f32 %v484_v40, 0.0  ;;  %v1371_v43 = vpop.f32.mrb[4].mxu0 }
  0xfa   : > { %v499_v44 = vadd.f32 %v1371_v43, %v1216_v30  ;;  %v493_v45 = vpop.f32.mrb[5].mxu0 }
  0xfb   : > { %1398 = vmatprep.mubr.msk.f32.mxu1 %vm579_vm1, %v554_v42  ;;  %v494_v46 = vadd.f32 %v1216_v30, %v493_v45 }
  0xfc   : > { %v557_v47 = vmax.f32 %v499_v44, 0.0  ;;  %1399 = vmatmul.mubr.msk.f32.gmra.mrb[2].mxu1 %vm579_vm1, %v555_v41 }
  0xfd   : > { %v556_v48 = vmax.f32 %v494_v46, 0.0  ;;  %v1374_v49 = vpop.f32.mrb[6].mxu0 }
  0xfe   : > { %v509_v50 = vadd.f32 %v1374_v49, %v1216_v30  ;;  %v503_v51 = vpop.f32.mrb[7].mxu0 }
  0xff   : > { %1401 = vmatprep.mubr.msk.f32.mxu1 %vm579_vm1, %v556_v48  ;;  %v504_v52 = vadd.f32 %v1216_v30, %v503_v51 }
 0x100   : > { %1402 = vmatmul.mubr.msk.f32.gmra.mrb[4].mxu1 %vm579_vm1, %v557_v47  ;;  %v559_v53 = vmax.f32 %v509_v50, 0.0 }
 0x101   : > { %v558_v54 = vmax.f32 %v504_v52, 0.0  ;;  %v1377_v55 = vpop.f32.mrb[8].mxu0 }
 0x102   : > { %v519_v56 = vadd.f32 %v1377_v55, %v1216_v30  ;;  %v513_v57 = vpop.f32.mrb[9].mxu0 }
 0x103   : > { %1404 = vmatprep.mubr.msk.f32.mxu1 %vm579_vm1, %v558_v54  ;;  %v514_v58 = vadd.f32 %v1216_v30, %v513_v57 }
 0x104   : > { %1405 = vmatmul.mubr.msk.f32.gmra.mrb[6].mxu1 %vm579_vm1, %v559_v53  ;;  %v561_v59 = vmax.f32 %v519_v56, 0.0 }
 0x105   : > { %v560_v60 = vmax.f32 %v514_v58, 0.0  ;;  %v1380_v61 = vpop.f32.mrb[10].mxu0 }
 0x106   : > { %v529_v62 = vadd.f32 %v1380_v61, %v1216_v30  ;;  %v523_v63 = vpop.f32.mrb[11].mxu0 }
 0x107   : > { %1407 = vmatprep.mubr.msk.f32.mxu1 %vm579_vm1, %v560_v60  ;;  %v524_v0 = vadd.f32 %v1216_v30, %v523_v63 }
 0x108   : > { %1408 = vmatmul.mubr.msk.f32.gmra.mrb[8].mxu1 %vm579_vm1, %v561_v59  ;;  %v563_v1 = vmax.f32 %v529_v62, 0.0 }
 0x109   : > { %v562_v2 = vmax.f32 %v524_v0, 0.0  ;;  %v1383_v3 = vpop.f32.mrb[12].mxu0  ;;  %v1642_v0 = vmov 0.0|0.0  }
 0x10a   : > { %v539_v4 = vadd.f32 %v1383_v3, %v1216_v30  ;;  %v533_v5 = vpop.f32.mrb[13].mxu0  ;;  %1502 = vmatprep.subr.bf16.mxu1 %v1642_v0  ;;  %v1645_v3 = vmov 0  }
 0x10b   : > { %1410 = vmatprep.mubr.msk.f32.mxu1 %vm579_vm1, %v562_v2  ;;  %v534_v6 = vadd.f32 %v1216_v30, %v533_v5  ;;  %v1010_v2 = vld [vmem:[#allocation2] sm:$0x1]  ;;  %1577 = vset.pattern.permute.xlu0 %v1645_v3 }
 0x10c   : > { %1411 = vmatmul.mubr.msk.f32.gmra.mrb[10].mxu1 %vm579_vm1, %v563_v1  ;;  %v565_v7 = vmax.f32 %v539_v4, 0.0  ;;  %v1644_v1 = vmov 0.0   ;;  %1013 = vperm.xlu0 %1577, %v1010_v2   ;;  %v1250_v4 = vld [vmem:[%s1941_s6] ss:$0 sm:$0xff] }
 0x10d   : > { %v564_v8 = vmax.f32 %v534_v6, 0.0  ;;  %v1386_v9 = vpop.f32.mrb[14].mxu0 }
 0x10e   : > { %v549_v10 = vadd.f32 %v1386_v9, %v1216_v30  ;;  %v543_v11 = vpop.f32.mrb[15].mxu0 }
 0x10f   : > { %1413 = vmatprep.mubr.msk.f32.mxu1 %vm579_vm1, %v564_v8  ;;  %v544_v12 = vadd.f32 %v1216_v30, %v543_v11 }
 0x110   : > { %1414 = vmatmul.mubr.msk.f32.gmra.mrb[12].mxu1 %vm579_vm1, %v565_v7  ;;  %v567_v13 = vmax.f32 %v549_v10, 0.0 }
 0x111   : > { %v566_v14 = vmax.f32 %v544_v12, 0.0 }
 0x113   : > { %1416 = vmatprep.mubr.msk.f32.mxu1 %vm579_vm1, %v566_v14 }
 0x114   : > { %1417 = vmatmul.mubr.msk.f32.gmra.mrb[14].mxu1 %vm579_vm1, %v567_v13 }
 0x115   : > { %1483 = vmatprep.mubr.msk.f32.mxu1 %vm1643_vm2, %v1644_v1 }
 0x18b   : > { %v1014_v3 = vpop.permute.xlu0 %1013 }
 0x1cb   : > { %v1397_v16 = vpop.f32.mrb[0].mxu1 }
 0x1cc   : > { %v700_v17 = vadd.f32 %v1397_v16, %v1233_v15  ;;  %v694_v18 = vpop.f32.mrb[1].mxu1 }
 0x1cd   : > { %v695_v19 = vadd.f32 %v1233_v15, %v694_v18 }
 0x1ce   : > { %v774_v22 = vmax.f32 %v700_v17, 0.0 }
 0x1cf   : > { %v773_v20 = vmax.f32 %v695_v19, 0.0  ;;  %v1400_v21 = vpop.f32.mrb[2].mxu1 }
 0x1d0   : > { %v710_v23 = vadd.f32 %v1400_v21, %v1233_v15  ;;  %v704_v24 = vpop.f32.mrb[3].mxu1 }
 0x1d1   : > { %v705_v25 = vadd.f32 %v1233_v15, %v704_v24  ;;  %1427 = vmatprep.mubr.msk.f32.mxu0 %vm579_vm1, %v773_v20 }
 0x1d2   : > { %v776_v26 = vmax.f32 %v710_v23, 0.0  ;;  %1428 = vmatmul.mubr.msk.f32.vlgmr.msra.gmra.mrb[16].mxu0 %vm579_vm1, %v774_v22 }
 0x1d3   : > { %v775_v27 = vmax.f32 %v705_v25, 0.0  ;;  %v1403_v28 = vpop.f32.mrb[4].mxu1 }
 0x1d4   : > { %v720_v29 = vadd.f32 %v1403_v28, %v1233_v15  ;;  %v714_v30 = vpop.f32.mrb[5].mxu1 }
 0x1d5   : > { %1430 = vmatprep.mubr.msk.f32.mxu0 %vm579_vm1, %v775_v27  ;;  %v715_v31 = vadd.f32 %v1233_v15, %v714_v30 }
 0x1d6   : > { %v778_v32 = vmax.f32 %v720_v29, 0.0  ;;  %1431 = vmatmul.mubr.msk.f32.gmra.mrb[18].mxu0 %vm579_vm1, %v776_v26 }
 0x1d7   : > { %v777_v33 = vmax.f32 %v715_v31, 0.0  ;;  %v1406_v34 = vpop.f32.mrb[6].mxu1 }
 0x1d8   : > { %v730_v35 = vadd.f32 %v1406_v34, %v1233_v15  ;;  %v724_v36 = vpop.f32.mrb[7].mxu1 }
 0x1d9   : > { %1433 = vmatprep.mubr.msk.f32.mxu0 %vm579_vm1, %v777_v33  ;;  %v725_v37 = vadd.f32 %v1233_v15, %v724_v36 }
 0x1da   : > { %1434 = vmatmul.mubr.msk.f32.gmra.mrb[20].mxu0 %vm579_vm1, %v778_v32  ;;  %v780_v38 = vmax.f32 %v730_v35, 0.0 }
 0x1db   : > { %v779_v39 = vmax.f32 %v725_v37, 0.0  ;;  %v1409_v40 = vpop.f32.mrb[8].mxu1 }
 0x1dc   : > { %v740_v41 = vadd.f32 %v1409_v40, %v1233_v15  ;;  %v734_v42 = vpop.f32.mrb[9].mxu1 }
 0x1dd   : > { %1436 = vmatprep.mubr.msk.f32.mxu0 %vm579_vm1, %v779_v39  ;;  %v735_v43 = vadd.f32 %v1233_v15, %v734_v42 }
 0x1de   : > { %1437 = vmatmul.mubr.msk.f32.gmra.mrb[22].mxu0 %vm579_vm1, %v780_v38  ;;  %v782_v44 = vmax.f32 %v740_v41, 0.0 }
 0x1df   : > { %v781_v45 = vmax.f32 %v735_v43, 0.0  ;;  %v1412_v46 = vpop.f32.mrb[10].mxu1 }
 0x1e0   : > { %v750_v47 = vadd.f32 %v1412_v46, %v1233_v15  ;;  %v744_v48 = vpop.f32.mrb[11].mxu1 }
 0x1e1   : > { %1439 = vmatprep.mubr.msk.f32.mxu0 %vm579_vm1, %v781_v45  ;;  %v745_v49 = vadd.f32 %v1233_v15, %v744_v48 }
 0x1e2   : > { %1440 = vmatmul.mubr.msk.f32.gmra.mrb[24].mxu0 %vm579_vm1, %v782_v44  ;;  %v784_v50 = vmax.f32 %v750_v47, 0.0 }
 0x1e3   : > { %v783_v51 = vmax.f32 %v745_v49, 0.0  ;;  %v1415_v52 = vpop.f32.mrb[12].mxu1 }
 0x1e4   : > { %v760_v53 = vadd.f32 %v1415_v52, %v1233_v15  ;;  %v754_v54 = vpop.f32.mrb[13].mxu1 }
 0x1e5   : > { %1442 = vmatprep.mubr.msk.f32.mxu0 %vm579_vm1, %v783_v51  ;;  %v755_v55 = vadd.f32 %v1233_v15, %v754_v54 }
 0x1e6   : > { %1443 = vmatmul.mubr.msk.f32.gmra.mrb[26].mxu0 %vm579_vm1, %v784_v50  ;;  %v786_v56 = vmax.f32 %v760_v53, 0.0 }
 0x1e7   : > { %v785_v57 = vmax.f32 %v755_v55, 0.0  ;;  %v1418_v58 = vpop.f32.mrb[14].mxu1 }
 0x1e8   : > { %v770_v59 = vadd.f32 %v1418_v58, %v1233_v15  ;;  %v764_v60 = vpop.f32.mrb[15].mxu1 }
 0x1e9   : > { %1445 = vmatprep.mubr.msk.f32.mxu0 %vm579_vm1, %v785_v57  ;;  %v765_v61 = vadd.f32 %v1233_v15, %v764_v60 }
 0x1ea   : > { %1446 = vmatmul.mubr.msk.f32.gmra.mrb[28].mxu0 %vm579_vm1, %v786_v56  ;;  %v788_v62 = vmax.f32 %v770_v59, 0.0 }
 0x1eb   : > { %v787_v63 = vmax.f32 %v765_v61, 0.0 }
 0x1ed   : > { %1448 = vmatprep.mubr.msk.f32.mxu0 %vm579_vm1, %v787_v63  ;;  %v1016_v63 = vlaneseq }
 0x1ee   : > { %1449 = vmatmul.mubr.msk.f32.gmra.mrb[30].mxu0 %vm579_vm1, %v788_v62  ;;  %v1009_v62 = vld [vmem:[%s1942_s7] sm:$0x1] }
 0x1ef   : > { %v1017_v1 = vshrl.u32 %v1016_v63, 7 }
 0x1f1   : > { %v1018_v2 = vsub.s32 0, %v1017_v1 }
 0x2a5   : > { %v1429_v5 = vpop.f32.mrb[16].mxu0 }
 0x2a6   : > { %v920_v6 = vadd.f32 %v1429_v5, %v1250_v4  ;;  %v914_v7 = vpop.f32.mrb[17].mxu0 }
 0x2a7   : > { %v915_v8 = vadd.f32 %v1250_v4, %v914_v7 }
 0x2a8   : > { %v994_v9 = vmax.f32 %v920_v6, 0.0 }
 0x2a9   : > { %v993_v10 = vmax.f32 %v915_v8, 0.0  ;;  %v1432_v11 = vpop.f32.mrb[18].mxu0 }
 0x2aa   : > { %v930_v12 = vadd.f32 %v1432_v11, %v1250_v4  ;;  %v924_v13 = vpop.f32.mrb[19].mxu0 }
 0x2ab   : > { %v1503_v15 = vpack.c.bf16 %v994_v9, %v993_v10  ;;  %v925_v16 = vadd.f32 %v1250_v4, %v924_v13 }
 0x2ac   : > { %v996_v17 = vmax.f32 %v930_v12, 0.0 }
 0x2ad   : > { %v995_v18 = vmax.f32 %v925_v16, 0.0  ;;  %1505 = vmatpush3.bf16.xpose.msk.msra.mxu1 %vm1857_vm3, %v1503_v15  ;;  %v1435_v19 = vpop.f32.mrb[20].mxu0 }
 0x2ae   : > { %v940_v20 = vadd.f32 %v1435_v19, %v1250_v4  ;;  %v934_v21 = vpop.f32.mrb[21].mxu0  ;;  %1506 = vmatprep.subr.bf16.mxu1 %v1642_v0 }
 0x2af   : > { %v1507_v22 = vpack.c.bf16 %v996_v17, %v995_v18  ;;  %v935_v23 = vadd.f32 %v1250_v4, %v934_v21 }
 0x2b0   : > { %v998_v24 = vmax.f32 %v940_v20, 0.0 }
 0x2b1   : > { %v997_v25 = vmax.f32 %v935_v23, 0.0  ;;  %v1438_v26 = vpop.f32.mrb[22].mxu0 }
 0x2b2   : > { %v950_v27 = vadd.f32 %v1438_v26, %v1250_v4  ;;  %v944_v28 = vpop.f32.mrb[23].mxu0 }
 0x2b3   : > { %v1511_v29 = vpack.c.bf16 %v998_v24, %v997_v25  ;;  %v945_v30 = vadd.f32 %v1250_v4, %v944_v28 }
 0x2b4   : > { %v1000_v31 = vmax.f32 %v950_v27, 0.0 }
 0x2b5   : > { %1509 = vmatpush3.bf16.xpose.msk.msra.mxu1 %vm1857_vm3, %v1507_v22  ;;  %v999_v32 = vmax.f32 %v945_v30, 0.0  ;;  %v1441_v33 = vpop.f32.mrb[24].mxu0 }
 0x2b6   : > { %1510 = vmatprep.subr.bf16.mxu1 %v1642_v0  ;;  %v960_v34 = vadd.f32 %v1441_v33, %v1250_v4  ;;  %v954_v35 = vpop.f32.mrb[25].mxu0 }
 0x2b7   : > { %v1515_v36 = vpack.c.bf16 %v1000_v31, %v999_v32  ;;  %v955_v37 = vadd.f32 %v1250_v4, %v954_v35 }
 0x2b8   : > { %v1002_v38 = vmax.f32 %v960_v34, 0.0 }
 0x2b9   : > { %v1001_v39 = vmax.f32 %v955_v37, 0.0  ;;  %v1444_v40 = vpop.f32.mrb[26].mxu0 }
 0x2ba   : > { %v970_v41 = vadd.f32 %v1444_v40, %v1250_v4  ;;  %v964_v42 = vpop.f32.mrb[27].mxu0 }
 0x2bb   : > { %v1519_v43 = vpack.c.bf16 %v1002_v38, %v1001_v39  ;;  %v965_v44 = vadd.f32 %v1250_v4, %v964_v42 }
 0x2bc   : > { %v1004_v45 = vmax.f32 %v970_v41, 0.0 }
 0x2bd   : > { %1513 = vmatpush3.bf16.xpose.msk.msra.mxu1 %vm1857_vm3, %v1511_v29  ;;  %v1003_v46 = vmax.f32 %v965_v44, 0.0  ;;  %v1447_v47 = vpop.f32.mrb[28].mxu0 }
 0x2be   : > { %1514 = vmatprep.subr.bf16.mxu1 %v1642_v0  ;;  %v980_v48 = vadd.f32 %v1447_v47, %v1250_v4  ;;  %v974_v49 = vpop.f32.mrb[29].mxu0 }
 0x2bf   : > { %v1523_v50 = vpack.c.bf16 %v1004_v45, %v1003_v46  ;;  %v975_v51 = vadd.f32 %v1250_v4, %v974_v49 }
 0x2c0   : > { %v1006_v52 = vmax.f32 %v980_v48, 0.0 }
 0x2c1   : > { %v1005_v53 = vmax.f32 %v975_v51, 0.0  ;;  %v1450_v54 = vpop.f32.mrb[30].mxu0 }
 0x2c2   : > { %v990_v55 = vadd.f32 %v1450_v54, %v1250_v4  ;;  %v984_v56 = vpop.f32.mrb[31].mxu0 }
 0x2c3   : > { %v1527_v57 = vpack.c.bf16 %v1006_v52, %v1005_v53  ;;  %v985_v58 = vadd.f32 %v1250_v4, %v984_v56  ;;  %v1019_v4 = vrot.slane %v1014_v3, %v1018_v2 }
 0x2c4   : > { %v1008_v59 = vmax.f32 %v990_v55, 0.0 }
 0x2c5   : > { %1517 = vmatpush3.bf16.xpose.msk.msra.mxu1 %vm1857_vm3, %v1515_v36  ;;  %v1007_v60 = vmax.f32 %v985_v58, 0.0 }
 0x2c6   : > { %1518 = vmatprep.subr.bf16.mxu1 %v1642_v0 }
 0x2c7   : > { %v1531_v61 = vpack.c.bf16 %v1008_v59, %v1007_v60 }
 0x2cd   : > { %1521 = vmatpush3.bf16.xpose.msk.msra.mxu1 %vm1857_vm3, %v1519_v43 }
 0x2ce   : > { %1522 = vmatprep.subr.bf16.mxu1 %v1642_v0 }
 0x2d5   : > { %1525 = vmatpush3.bf16.xpose.msk.msra.mxu1 %vm1857_vm3, %v1523_v50 }
 0x2d6   : > { %1526 = vmatprep.subr.bf16.mxu1 %v1642_v0 }
 0x2dd   : > { %1529 = vmatpush3.bf16.xpose.msk.msra.mxu1 %vm1857_vm3, %v1527_v57 }
 0x2de   : > { %1530 = vmatprep.subr.bf16.mxu1 %v1642_v0 }
 0x2e5   : > { %1533 = vmatpush3.bf16.xpose.msk.msra.mxu1 %vm1857_vm3, %v1531_v61 }
 0x2ec   : > { %1484 = vmatmul.mubr.msk.f32.vlgmr.msra.gmra.mrb[16].mxu1 %vm579_vm1, %v1009_v62 }
 0x3bf   : > { %v1137_v5 = vpop.f32.mrb[16].mxu1 }
 0x3c0   : > { %v1138_v0 = vadd.f32 %v1137_v5, %v1019_v4  ;;  %v1485_v6 = vpop.f32.mrb[17].mxu1 }
 0x3c2   : > { %1141 = vst [vmem:[%s327_s29] sm:$0x1] %v1138_v0 }
 0x3c3   : > { %1591 = shalt.err (!%p1588_p3)
}
 0x3c4   : > { %s1592_s24 = scalar_lea.hbm %s1893_s15, 16  ;;  %s1596_s28 = scalar_lea.hbm %s1944_s9, 32 }
 0x3c5   : > { %p1593_p4 = scmp.ne.s32.totalorder %s1893_s15, %s1592_s24  ;;  %p1597_p9 = scmp.lt.u32.totalorder %s1893_s15, %s1944_s9 }
 0x3c6   : > { %p1598_p10 = scmp.lt.u32.totalorder %s1596_s28, %s1592_s24  ;;  %p1600_p12 = scmp.lt.u32.totalorder %s1592_s24, %s1893_s15 }
 0x3c7   : > { %p1594_p7 = pnand %p1593_p4, %p1735_p5 }
 0x3c8   : > { %p1599_p11 = por %p1598_p10, %p1597_p9 }
 0x3c9   : > { %p1595_p8 = pneg %p1594_p7 }
 0x3ca   : > { %p1601_p13 = por %p1600_p12, %p1599_p11 }
 0x3cc   : > { %p1602_p0 = pnand %p1601_p13, %p1595_p8 }
 0x3ce   : > { %1605 = shalt.err (!%p1602_p0)
}
 0x3cf   : > { %1534 = dma.vmem_to_hbm [thread:$0]  (%p1735_p5), %s1895_s30, 16, %s1893_s15, %s1143_s17  }
 0x3d0 PF: > { %p1540_p1 = scmp.ge.s32.totalorder %s1640_s14, 2  ;;  %s1167_s8 = sand.u32 1, %s1628_s11  }
 0x3d1   : > { %s1168_s18 = scalar_lea.sflag [#allocation4], %s1167_s8 }
 0x3d2   : > { %p1537_p2 = pnand %p1540_p1, %p1739_p6 }
 0x3d4   : > { %1623 = dma.done.wait (!%p1537_p2), %s1168_s18, 16  }
 0x3d5   : > { %1625 = vsyncadd (!%p1537_p2), %s1168_s18, 4294967280  ;;  %p21_p3 = scmp.ge.s32.totalorder %s1723_s16, 4   ;;  %s1949_s11 = smov %s1632_s12 }
 0x3d6   : > { %s1950_s12 = smov %s1636_s13  ;;  %s1951_s13 = smov %s1733_s19 }
 0x3d7   : > { %s1952_s14 = smov %s1723_s16  ;;  %23 = sbr.rel (!%p21_p3) target bundleno = 6 (0x6), region = 91 }
 0x3de   :  { %1172 = vsyncpa [#allocation4], 1 }
 0x3df   :  { %1174 = vsyncpa [#allocation4 + $0x1], 1 }

// kernel: _deepnn_forward_impl.1
= control target key start
LH: loop header
LB: loop body
LE: loop exit
PB: predicated region body
PF: predicated region fallthrough
CT: control target
= control target key end

     0   :  { %s1935_s0 = inlined_call_operand.vmem [shape: f32[256,8], index: 0, kind: input, shape index: {}]   ;;  %s1936_s1 = inlined_call_operand.vmem [shape: f32[8,32], index: 1, kind: input, shape index: {}]   ;;  %s1937_s2 = inlined_call_operand.vmem [shape: f32[1,32], index: 2, kind: input, shape index: {}]   ;;  %s1938_s3 = inlined_call_operand.vmem [shape: f32[32,32], index: 3, kind: input, shape index: {}]   ;;  %s1939_s4 = inlined_call_operand.vmem [shape: f32[1,32], index: 4, kind: input, shape index: {}]   ;;  %s1940_s5 = inlined_call_operand.vmem [shape: f32[32,32], index: 5, kind: input, shape index: {}]   ;;  %s1941_s6 = inlined_call_operand.vmem [shape: f32[1,32], index: 6, kind: input, shape index: {}]   ;;  %s1942_s7 = inlined_call_operand.vmem [shape: f32[1,32], index: 7, kind: input, shape index: {}]   ;;  %s1943_s8 = inlined_call_operand.<no memory space> [shape: f32[1,1], index: 8, kind: input, shape index: {}]   ;;  %s1944_s9 = inlined_call_operand.hbm [shape: f32[1,256], index: 9, kind: output, shape index: {}]  }
   0x1   :  { %v14_v0 = vstv %s1943_s8 }
   0x2   :  { %15 = vst [vmem:[#allocation2] sm:$0x1] %v14_v0 }
   0x3   :  { %16 = vsyncpa [#allocation4], 0 }
   0x4   :  { %18 = vsyncpa [#allocation4 + $0x1], 0  ;;  %s1700_s11 = smov 0   ;;  %s1702_s12 = smov 0  }
   0x5   :  { %s1704_s13 = smov 0   ;;  %s1706_s14 = smov 0  }
   0x6 LB: > { %s1209_s8 = sadd.s32 4294967295, %s1640_s14   ;;  %s1210_s15 = sadd.s32 4294967294, %s1640_s14   ;;  %s1640_s14 = sphi %s1706_s14, %s1952_s14   ;;  %s1636_s13 = sphi %s1704_s13, %s1951_s13   ;;  %s1632_s12 = sphi %s1702_s12, %s1950_s12   ;;  %s1628_s11 = sphi %s1700_s11, %s1949_s11  }
   0x7   : > { %s1723_s16 = sadd.s32 1, %s1640_s14   ;;  %s225_s17 = sadd.s32 1, %s1636_s13 }
   0x8   : > { %s222_s18 = ssub.s32 %s1640_s14, %s1723_s16  ;;  %p235_p0 = scmp.ne.s32.totalorder %s1636_s13, %s1632_s12 }
   0x9   : > { %p223_p1 = scmp.eq.s32.totalorder %s222_s18, 0  ;;  %p236_p2 = scmp.eq.s32.totalorder %s1209_s8, 1 }
   0xa   : > { %p241_p3 = scmp.ne.s32.totalorder %s1632_s12, %s1628_s11  ;;  %p242_p4 = scmp.eq.s32.totalorder %s1210_s15, 1 }
   0xb   : > { %s1733_s19 = scalar_select %p223_p1, %s1636_s13, %s225_s17  }
   0xc   : > { %p1735_p5 = por %p236_p2, %p235_p0  ;;  %p1739_p6 = por %p242_p4, %p241_p3 }
   0xd   : > { %p1213_p7 = scmp.ge.s32.totalorder %s1640_s14, 1  ;;  %p293_p8 = scmp.lt.s32.totalorder %s1640_s14, 3 }
   0xf   : > { %p294_p9 = pnand %p1213_p7, %p293_p8 }
  0x10   : > { %v350_v1 = vld [vmem:[%s1936_s1] sm:$0xff] (!%p294_p9)  ;;  %s1748_s24 = sshll.u32 (!%p294_p9), %s1209_s8, 4  ;;  %v569_v3 = vld [vmem:[%s1938_s3 + $0x8] sm:$0xff] (!%p294_p9)  ;;  %vm358_vm0 = vcmask (!%p294_p9), 64512   ;;  %v570_v21 = vld [vmem:[%s1938_s3 + $0x10] sm:$0xff] (!%p294_p9)  ;;  %vm579_vm1 = vcmask (!%p294_p9), 261120  }
  0x11   : > { %297 = sbr.rel (%p294_p9) target bundleno = 976 (0x3d0), region = 56  ;;  %v568_v2 = vld [vmem:[%s1938_s3] sm:$0xff] (!%p294_p9)  ;;  %1361 = vmatprep.subr.mxu0 (!%p294_p9), %v350_v1  ;;  %p329_p10 = scmp.lt.s32.totalorder (!%p294_p9), %s1748_s24, 31  ;;  %v571_v22 = vld [vmem:[%s1938_s3 + $0x18] sm:$0xff] (!%p294_p9)  ;;  %v790_v25 = vld [vmem:[%s1940_s5 + $0x8] sm:$0xff] (!%p294_p9)  ;;  %vm1643_vm2 = vmmov (!%p294_p9), 0  }
  0x12   : > { %v1486_v4 = vpack.c.bf16 (!%p294_p9), %v569_v3, %v568_v2  ;;  %1362 = vmatpush3.msra.mxu0 (!%p294_p9), %v350_v1  ;;  %v1490_v23 = vpack.c.bf16 (!%p294_p9), %v571_v22, %v570_v21  ;;  %v789_v24 = vld [vmem:[%s1940_s5] sm:$0xff] (!%p294_p9)  ;;  %v791_v26 = vld [vmem:[%s1940_s5 + $0x10] sm:$0xff] (!%p294_p9)  ;;  %v792_v28 = vld [vmem:[%s1940_s5 + $0x18] sm:$0xff] (!%p294_p9)  ;;  %s326_s28 = sand.u32 (!%p294_p9), 1, %s1632_s12   ;;  %s1646_s22 = smov (!%p294_p9), [#allocation3]  }
  0x13   : > { %v1494_v27 = vpack.c.bf16 (!%p294_p9), %v790_v25, %v789_v24  ;;  %v1498_v29 = vpack.c.bf16 (!%p294_p9), %v792_v28, %v791_v26  ;;  %v1216_v30 = vld [vmem:[%s1937_s2] ss:$0 sm:$0xff] (!%p294_p9)  ;;  %vm1857_vm3 = vmpackc.low (!%p294_p9), %vm579_vm1, %vm579_vm1  ;;  %s1143_s17 = scalar_lea.sflag (!%p294_p9), [#allocation4], %s326_s28  ;;  %s1582_s23 = sshll.u32 (!%p294_p9), %s1646_s22, 4  ;;  %s1583_s23 = int_to_ptr.vmem [resolvable:$false] %s1582_s23 }
  0x14   : > { %1487 = vmatprep.subr.bf16.mxu1 (!%p294_p9), %v1486_v4  ;;  %s1584_s25 = scalar_lea.vmem (!%p294_p9), %s1583_s23, 32 }
  0x15   : > { %1489 = vmatpush3.bf16.msra.mxu1 (!%p294_p9), %v1486_v4  ;;  %1495 = vmatprep.subr.bf16.mxu0 (!%p294_p9), %v1494_v27 }
  0x16   : > { %1491 = vmatprep.subr.bf16.mxu1 (!%p294_p9), %v1490_v23 }
  0x18   : > { %s330_s29 = scalar_select %p329_p10, %s1748_s24, 31 }
  0x19   : > { %1493 = vmatpush3.bf16.msra.mxu1 %v1490_v23 }
  0x1a   : > { %s1215_s30 = sshll.u32 %s330_s29, 3  ;;  %s327_s29 = scalar_lea.vmem [#allocation3], %s326_s28 }
  0x1b   : > { %s1761_s15 = scalar_lea.vmem %s1935_s0, %s1215_s30  ;;  %s1155_s30 = sshll.u32 %s327_s29, 4  ;;  %s1895_s30 = int_to_ptr.vmem [resolvable:$true] %s1155_s30 }
  0x1c   : > { %v334_v5 = vld [vmem:[%s1761_s15] sm:$0xff]  ;;  %v335_v6 = vld [vmem:[%s1761_s15 + $0x8] sm:$0xff]  ;;  %v336_v7 = vld [vmem:[%s1761_s15 + $0x10] sm:$0xff]  ;;  %s1578_s18 = scalar_lea.vmem %s1895_s30, 16  ;;  %p1585_p0 = scmp.lt.s32.totalorder %s1895_s30, %s1583_s23 }
  0x1d   : > { %1363 = vmatprep.mubr.msk.f32.mxu0 %vm358_vm0, %v334_v5  ;;  %v337_v8 = vld [vmem:[%s1761_s15 + $0x18] sm:$0xff]  ;;  %v338_v9 = vld [vmem:[%s1761_s15 + $0x20] sm:$0xff]  ;;  %v339_v10 = vld [vmem:[%s1761_s15 + $0x28] sm:$0xff]  ;;  %p1579_p11 = scmp.ne.s32.totalorder %s1895_s30, %s1578_s18  ;;  %p1586_p1 = scmp.lt.s32.totalorder %s1584_s25, %s1578_s18 }
  0x1e   : > { %1364 = vmatmul.mubr.msk.f32.vlgmr.msra.gmra.mrb[0].mxu0 %vm358_vm0, %v335_v6  ;;  %v340_v11 = vld [vmem:[%s1761_s15 + $0x30] sm:$0xff]  ;;  %v341_v12 = vld [vmem:[%s1761_s15 + $0x38] sm:$0xff]  ;;  %v342_v13 = vld [vmem:[%s1761_s15 + $0x40] sm:$0xff] }
  0x1f   : > { %1366 = vmatprep.mubr.msk.f32.mxu0 %vm358_vm0, %v336_v7  ;;  %v343_v14 = vld [vmem:[%s1761_s15 + $0x48] sm:$0xff]  ;;  %v344_v15 = vld [vmem:[%s1761_s15 + $0x50] sm:$0xff]  ;;  %v345_v16 = vld [vmem:[%s1761_s15 + $0x58] sm:$0xff]  ;;  %1497 = vmatpush3.bf16.msra.mxu0 %v1494_v27  ;;  %p1580_p12 = pnand %p1579_p11, %p1735_p5  ;;  %p1587_p2 = por %p1586_p1, %p1585_p0 }
  0x20   : > { %v346_v17 = vld [vmem:[%s1761_s15 + $0x60] sm:$0xff]  ;;  %v347_v18 = vld [vmem:[%s1761_s15 + $0x68] sm:$0xff]  ;;  %v348_v19 = vld [vmem:[%s1761_s15 + $0x70] sm:$0xff]  ;;  %1499 = vmatprep.subr.bf16.mxu0 %v1498_v29 }
  0x21   : > { %v349_v20 = vld [vmem:[%s1761_s15 + $0x78] sm:$0xff]  ;;  %s1893_s15 = scalar_lea.hbm %s1944_s9, %s1748_s24  ;;  %p1581_p13 = pneg %p1580_p12 }
  0x22   : > { %1367 = vmatmul.mubr.msk.f32.gmra.mrb[2].mxu0 %vm358_vm0, %v337_v8 }
  0x23   : > { %1369 = vmatprep.mubr.msk.f32.mxu0 %vm358_vm0, %v338_v9  ;;  %1501 = vmatpush3.bf16.msra.mxu0 %v1498_v29  ;;  %p1588_p3 = pnand %p1587_p2, %p1581_p13 }
  0x26   : > { %1370 = vmatmul.mubr.msk.f32.gmra.mrb[4].mxu0 %vm358_vm0, %v339_v10 }
  0x27   : > { %1372 = vmatprep.mubr.msk.f32.mxu0 %vm358_vm0, %v340_v11 }
  0x2a   : > { %1373 = vmatmul.mubr.msk.f32.gmra.mrb[6].mxu0 %vm358_vm0, %v341_v12 }
  0x2b   : > { %1375 = vmatprep.mubr.msk.f32.mxu0 %vm358_vm0, %v342_v13 }
  0x2e   : > { %1376 = vmatmul.mubr.msk.f32.gmra.mrb[8].mxu0 %vm358_vm0, %v343_v14 }
  0x2f   : > { %1378 = vmatprep.mubr.msk.f32.mxu0 %vm358_vm0, %v344_v15  ;;  %v1233_v15 = vld [vmem:[%s1939_s4] ss:$0 sm:$0xff] }
  0x32   : > { %1379 = vmatmul.mubr.msk.f32.gmra.mrb[10].mxu0 %vm358_vm0, %v345_v16 }
  0x33   : > { %1381 = vmatprep.mubr.msk.f32.mxu0 %vm358_vm0, %v346_v17 }
  0x36   : > { %1382 = vmatmul.mubr.msk.f32.gmra.mrb[12].mxu0 %vm358_vm0, %v347_v18 }
  0x37   : > { %1384 = vmatprep.mubr.msk.f32.mxu0 %vm358_vm0, %v348_v19 }
  0x3a   : > { %1385 = vmatmul.mubr.msk.f32.gmra.mrb[14].mxu0 %vm358_vm0, %v349_v20 }
  0xf1   : > { %v1365_v31 = vpop.f32.mrb[0].mxu0 }
  0xf2   : > { %v479_v32 = vadd.f32 %v1365_v31, %v1216_v30  ;;  %v473_v33 = vpop.f32.mrb[1].mxu0 }
  0xf3   : > { %v474_v34 = vadd.f32 %v1216_v30, %v473_v33 }
  0xf4   : > { %v553_v37 = vmax.f32 %v479_v32, 0.0 }
  0xf5   : > { %v552_v35 = vmax.f32 %v474_v34, 0.0  ;;  %v1368_v36 = vpop.f32.mrb[2].mxu0 }
  0xf6   : > { %v489_v38 = vadd.f32 %v1368_v36, %v1216_v30  ;;  %v483_v39 = vpop.f32.mrb[3].mxu0 }
  0xf7   : > { %v484_v40 = vadd.f32 %v1216_v30, %v483_v39  ;;  %1395 = vmatprep.mubr.msk.f32.mxu1 %vm579_vm1, %v552_v35 }
  0xf8   : > { %v555_v41 = vmax.f32 %v489_v38, 0.0  ;;  %1396 = vmatmul.mubr.msk.f32.vlgmr.msra.gmra.mrb[0].mxu1 %vm579_vm1, %v553_v37 }
  0xf9   : > { %v554_v42 = vmax.f32 %v484_v40, 0.0  ;;  %v1371_v43 = vpop.f32.mrb[4].mxu0 }
  0xfa   : > { %v499_v44 = vadd.f32 %v1371_v43, %v1216_v30  ;;  %v493_v45 = vpop.f32.mrb[5].mxu0 }
  0xfb   : > { %1398 = vmatprep.mubr.msk.f32.mxu1 %vm579_vm1, %v554_v42  ;;  %v494_v46 = vadd.f32 %v1216_v30, %v493_v45 }
  0xfc   : > { %v557_v47 = vmax.f32 %v499_v44, 0.0  ;;  %1399 = vmatmul.mubr.msk.f32.gmra.mrb[2].mxu1 %vm579_vm1, %v555_v41 }
  0xfd   : > { %v556_v48 = vmax.f32 %v494_v46, 0.0  ;;  %v1374_v49 = vpop.f32.mrb[6].mxu0 }
  0xfe   : > { %v509_v50 = vadd.f32 %v1374_v49, %v1216_v30  ;;  %v503_v51 = vpop.f32.mrb[7].mxu0 }
  0xff   : > { %1401 = vmatprep.mubr.msk.f32.mxu1 %vm579_vm1, %v556_v48  ;;  %v504_v52 = vadd.f32 %v1216_v30, %v503_v51 }
 0x100   : > { %1402 = vmatmul.mubr.msk.f32.gmra.mrb[4].mxu1 %vm579_vm1, %v557_v47  ;;  %v559_v53 = vmax.f32 %v509_v50, 0.0 }
 0x101   : > { %v558_v54 = vmax.f32 %v504_v52, 0.0  ;;  %v1377_v55 = vpop.f32.mrb[8].mxu0 }
 0x102   : > { %v519_v56 = vadd.f32 %v1377_v55, %v1216_v30  ;;  %v513_v57 = vpop.f32.mrb[9].mxu0 }
 0x103   : > { %1404 = vmatprep.mubr.msk.f32.mxu1 %vm579_vm1, %v558_v54  ;;  %v514_v58 = vadd.f32 %v1216_v30, %v513_v57 }
 0x104   : > { %1405 = vmatmul.mubr.msk.f32.gmra.mrb[6].mxu1 %vm579_vm1, %v559_v53  ;;  %v561_v59 = vmax.f32 %v519_v56, 0.0 }
 0x105   : > { %v560_v60 = vmax.f32 %v514_v58, 0.0  ;;  %v1380_v61 = vpop.f32.mrb[10].mxu0 }
 0x106   : > { %v529_v62 = vadd.f32 %v1380_v61, %v1216_v30  ;;  %v523_v63 = vpop.f32.mrb[11].mxu0 }
 0x107   : > { %1407 = vmatprep.mubr.msk.f32.mxu1 %vm579_vm1, %v560_v60  ;;  %v524_v0 = vadd.f32 %v1216_v30, %v523_v63 }
 0x108   : > { %1408 = vmatmul.mubr.msk.f32.gmra.mrb[8].mxu1 %vm579_vm1, %v561_v59  ;;  %v563_v1 = vmax.f32 %v529_v62, 0.0 }
 0x109   : > { %v562_v2 = vmax.f32 %v524_v0, 0.0  ;;  %v1383_v3 = vpop.f32.mrb[12].mxu0  ;;  %v1642_v0 = vmov 0.0|0.0  }
 0x10a   : > { %v539_v4 = vadd.f32 %v1383_v3, %v1216_v30  ;;  %v533_v5 = vpop.f32.mrb[13].mxu0  ;;  %1502 = vmatprep.subr.bf16.mxu1 %v1642_v0  ;;  %v1645_v3 = vmov 0  }
 0x10b   : > { %1410 = vmatprep.mubr.msk.f32.mxu1 %vm579_vm1, %v562_v2  ;;  %v534_v6 = vadd.f32 %v1216_v30, %v533_v5  ;;  %v1010_v2 = vld [vmem:[#allocation2] sm:$0x1]  ;;  %1577 = vset.pattern.permute.xlu0 %v1645_v3 }
 0x10c   : > { %1411 = vmatmul.mubr.msk.f32.gmra.mrb[10].mxu1 %vm579_vm1, %v563_v1  ;;  %v565_v7 = vmax.f32 %v539_v4, 0.0  ;;  %v1644_v1 = vmov 0.0   ;;  %1013 = vperm.xlu0 %1577, %v1010_v2   ;;  %v1250_v4 = vld [vmem:[%s1941_s6] ss:$0 sm:$0xff] }
 0x10d   : > { %v564_v8 = vmax.f32 %v534_v6, 0.0  ;;  %v1386_v9 = vpop.f32.mrb[14].mxu0 }
 0x10e   : > { %v549_v10 = vadd.f32 %v1386_v9, %v1216_v30  ;;  %v543_v11 = vpop.f32.mrb[15].mxu0 }
 0x10f   : > { %1413 = vmatprep.mubr.msk.f32.mxu1 %vm579_vm1, %v564_v8  ;;  %v544_v12 = vadd.f32 %v1216_v30, %v543_v11 }
 0x110   : > { %1414 = vmatmul.mubr.msk.f32.gmra.mrb[12].mxu1 %vm579_vm1, %v565_v7  ;;  %v567_v13 = vmax.f32 %v549_v10, 0.0 }
 0x111   : > { %v566_v14 = vmax.f32 %v544_v12, 0.0 }
 0x113   : > { %1416 = vmatprep.mubr.msk.f32.mxu1 %vm579_vm1, %v566_v14 }
 0x114   : > { %1417 = vmatmul.mubr.msk.f32.gmra.mrb[14].mxu1 %vm579_vm1, %v567_v13 }
 0x115   : > { %1483 = vmatprep.mubr.msk.f32.mxu1 %vm1643_vm2, %v1644_v1 }
 0x18b   : > { %v1014_v3 = vpop.permute.xlu0 %1013 }
 0x1cb   : > { %v1397_v16 = vpop.f32.mrb[0].mxu1 }
 0x1cc   : > { %v700_v17 = vadd.f32 %v1397_v16, %v1233_v15  ;;  %v694_v18 = vpop.f32.mrb[1].mxu1 }
 0x1cd   : > { %v695_v19 = vadd.f32 %v1233_v15, %v694_v18 }
 0x1ce   : > { %v774_v22 = vmax.f32 %v700_v17, 0.0 }
 0x1cf   : > { %v773_v20 = vmax.f32 %v695_v19, 0.0  ;;  %v1400_v21 = vpop.f32.mrb[2].mxu1 }
 0x1d0   : > { %v710_v23 = vadd.f32 %v1400_v21, %v1233_v15  ;;  %v704_v24 = vpop.f32.mrb[3].mxu1 }
 0x1d1   : > { %v705_v25 = vadd.f32 %v1233_v15, %v704_v24  ;;  %1427 = vmatprep.mubr.msk.f32.mxu0 %vm579_vm1, %v773_v20 }
 0x1d2   : > { %v776_v26 = vmax.f32 %v710_v23, 0.0  ;;  %1428 = vmatmul.mubr.msk.f32.vlgmr.msra.gmra.mrb[16].mxu0 %vm579_vm1, %v774_v22 }
 0x1d3   : > { %v775_v27 = vmax.f32 %v705_v25, 0.0  ;;  %v1403_v28 = vpop.f32.mrb[4].mxu1 }
 0x1d4   : > { %v720_v29 = vadd.f32 %v1403_v28, %v1233_v15  ;;  %v714_v30 = vpop.f32.mrb[5].mxu1 }
 0x1d5   : > { %1430 = vmatprep.mubr.msk.f32.mxu0 %vm579_vm1, %v775_v27  ;;  %v715_v31 = vadd.f32 %v1233_v15, %v714_v30 }
 0x1d6   : > { %v778_v32 = vmax.f32 %v720_v29, 0.0  ;;  %1431 = vmatmul.mubr.msk.f32.gmra.mrb[18].mxu0 %vm579_vm1, %v776_v26 }
 0x1d7   : > { %v777_v33 = vmax.f32 %v715_v31, 0.0  ;;  %v1406_v34 = vpop.f32.mrb[6].mxu1 }
 0x1d8   : > { %v730_v35 = vadd.f32 %v1406_v34, %v1233_v15  ;;  %v724_v36 = vpop.f32.mrb[7].mxu1 }
 0x1d9   : > { %1433 = vmatprep.mubr.msk.f32.mxu0 %vm579_vm1, %v777_v33  ;;  %v725_v37 = vadd.f32 %v1233_v15, %v724_v36 }
 0x1da   : > { %1434 = vmatmul.mubr.msk.f32.gmra.mrb[20].mxu0 %vm579_vm1, %v778_v32  ;;  %v780_v38 = vmax.f32 %v730_v35, 0.0 }
 0x1db   : > { %v779_v39 = vmax.f32 %v725_v37, 0.0  ;;  %v1409_v40 = vpop.f32.mrb[8].mxu1 }
 0x1dc   : > { %v740_v41 = vadd.f32 %v1409_v40, %v1233_v15  ;;  %v734_v42 = vpop.f32.mrb[9].mxu1 }
 0x1dd   : > { %1436 = vmatprep.mubr.msk.f32.mxu0 %vm579_vm1, %v779_v39  ;;  %v735_v43 = vadd.f32 %v1233_v15, %v734_v42 }
 0x1de   : > { %1437 = vmatmul.mubr.msk.f32.gmra.mrb[22].mxu0 %vm579_vm1, %v780_v38  ;;  %v782_v44 = vmax.f32 %v740_v41, 0.0 }
 0x1df   : > { %v781_v45 = vmax.f32 %v735_v43, 0.0  ;;  %v1412_v46 = vpop.f32.mrb[10].mxu1 }
 0x1e0   : > { %v750_v47 = vadd.f32 %v1412_v46, %v1233_v15  ;;  %v744_v48 = vpop.f32.mrb[11].mxu1 }
 0x1e1   : > { %1439 = vmatprep.mubr.msk.f32.mxu0 %vm579_vm1, %v781_v45  ;;  %v745_v49 = vadd.f32 %v1233_v15, %v744_v48 }
 0x1e2   : > { %1440 = vmatmul.mubr.msk.f32.gmra.mrb[24].mxu0 %vm579_vm1, %v782_v44  ;;  %v784_v50 = vmax.f32 %v750_v47, 0.0 }
 0x1e3   : > { %v783_v51 = vmax.f32 %v745_v49, 0.0  ;;  %v1415_v52 = vpop.f32.mrb[12].mxu1 }
 0x1e4   : > { %v760_v53 = vadd.f32 %v1415_v52, %v1233_v15  ;;  %v754_v54 = vpop.f32.mrb[13].mxu1 }
 0x1e5   : > { %1442 = vmatprep.mubr.msk.f32.mxu0 %vm579_vm1, %v783_v51  ;;  %v755_v55 = vadd.f32 %v1233_v15, %v754_v54 }
 0x1e6   : > { %1443 = vmatmul.mubr.msk.f32.gmra.mrb[26].mxu0 %vm579_vm1, %v784_v50  ;;  %v786_v56 = vmax.f32 %v760_v53, 0.0 }
 0x1e7   : > { %v785_v57 = vmax.f32 %v755_v55, 0.0  ;;  %v1418_v58 = vpop.f32.mrb[14].mxu1 }
 0x1e8   : > { %v770_v59 = vadd.f32 %v1418_v58, %v1233_v15  ;;  %v764_v60 = vpop.f32.mrb[15].mxu1 }
 0x1e9   : > { %1445 = vmatprep.mubr.msk.f32.mxu0 %vm579_vm1, %v785_v57  ;;  %v765_v61 = vadd.f32 %v1233_v15, %v764_v60 }
 0x1ea   : > { %1446 = vmatmul.mubr.msk.f32.gmra.mrb[28].mxu0 %vm579_vm1, %v786_v56  ;;  %v788_v62 = vmax.f32 %v770_v59, 0.0 }
 0x1eb   : > { %v787_v63 = vmax.f32 %v765_v61, 0.0 }
 0x1ed   : > { %1448 = vmatprep.mubr.msk.f32.mxu0 %vm579_vm1, %v787_v63  ;;  %v1016_v63 = vlaneseq }
 0x1ee   : > { %1449 = vmatmul.mubr.msk.f32.gmra.mrb[30].mxu0 %vm579_vm1, %v788_v62  ;;  %v1009_v62 = vld [vmem:[%s1942_s7] sm:$0x1] }
 0x1ef   : > { %v1017_v1 = vshrl.u32 %v1016_v63, 7 }
 0x1f1   : > { %v1018_v2 = vsub.s32 0, %v1017_v1 }
 0x2a5   : > { %v1429_v5 = vpop.f32.mrb[16].mxu0 }
 0x2a6   : > { %v920_v6 = vadd.f32 %v1429_v5, %v1250_v4  ;;  %v914_v7 = vpop.f32.mrb[17].mxu0 }
 0x2a7   : > { %v915_v8 = vadd.f32 %v1250_v4, %v914_v7 }
 0x2a8   : > { %v994_v9 = vmax.f32 %v920_v6, 0.0 }
 0x2a9   : > { %v993_v10 = vmax.f32 %v915_v8, 0.0  ;;  %v1432_v11 = vpop.f32.mrb[18].mxu0 }
 0x2aa   : > { %v930_v12 = vadd.f32 %v1432_v11, %v1250_v4  ;;  %v924_v13 = vpop.f32.mrb[19].mxu0 }
 0x2ab   : > { %v1503_v15 = vpack.c.bf16 %v994_v9, %v993_v10  ;;  %v925_v16 = vadd.f32 %v1250_v4, %v924_v13 }
 0x2ac   : > { %v996_v17 = vmax.f32 %v930_v12, 0.0 }
 0x2ad   : > { %v995_v18 = vmax.f32 %v925_v16, 0.0  ;;  %1505 = vmatpush3.bf16.xpose.msk.msra.mxu1 %vm1857_vm3, %v1503_v15  ;;  %v1435_v19 = vpop.f32.mrb[20].mxu0 }
 0x2ae   : > { %v940_v20 = vadd.f32 %v1435_v19, %v1250_v4  ;;  %v934_v21 = vpop.f32.mrb[21].mxu0  ;;  %1506 = vmatprep.subr.bf16.mxu1 %v1642_v0 }
 0x2af   : > { %v1507_v22 = vpack.c.bf16 %v996_v17, %v995_v18  ;;  %v935_v23 = vadd.f32 %v1250_v4, %v934_v21 }
 0x2b0   : > { %v998_v24 = vmax.f32 %v940_v20, 0.0 }
 0x2b1   : > { %v997_v25 = vmax.f32 %v935_v23, 0.0  ;;  %v1438_v26 = vpop.f32.mrb[22].mxu0 }
 0x2b2   : > { %v950_v27 = vadd.f32 %v1438_v26, %v1250_v4  ;;  %v944_v28 = vpop.f32.mrb[23].mxu0 }
 0x2b3   : > { %v1511_v29 = vpack.c.bf16 %v998_v24, %v997_v25  ;;  %v945_v30 = vadd.f32 %v1250_v4, %v944_v28 }
 0x2b4   : > { %v1000_v31 = vmax.f32 %v950_v27, 0.0 }
 0x2b5   : > { %1509 = vmatpush3.bf16.xpose.msk.msra.mxu1 %vm1857_vm3, %v1507_v22  ;;  %v999_v32 = vmax.f32 %v945_v30, 0.0  ;;  %v1441_v33 = vpop.f32.mrb[24].mxu0 }
 0x2b6   : > { %1510 = vmatprep.subr.bf16.mxu1 %v1642_v0  ;;  %v960_v34 = vadd.f32 %v1441_v33, %v1250_v4  ;;  %v954_v35 = vpop.f32.mrb[25].mxu0 }
 0x2b7   : > { %v1515_v36 = vpack.c.bf16 %v1000_v31, %v999_v32  ;;  %v955_v37 = vadd.f32 %v1250_v4, %v954_v35 }
 0x2b8   : > { %v1002_v38 = vmax.f32 %v960_v34, 0.0 }
 0x2b9   : > { %v1001_v39 = vmax.f32 %v955_v37, 0.0  ;;  %v1444_v40 = vpop.f32.mrb[26].mxu0 }
 0x2ba   : > { %v970_v41 = vadd.f32 %v1444_v40, %v1250_v4  ;;  %v964_v42 = vpop.f32.mrb[27].mxu0 }
 0x2bb   : > { %v1519_v43 = vpack.c.bf16 %v1002_v38, %v1001_v39  ;;  %v965_v44 = vadd.f32 %v1250_v4, %v964_v42 }
 0x2bc   : > { %v1004_v45 = vmax.f32 %v970_v41, 0.0 }
 0x2bd   : > { %1513 = vmatpush3.bf16.xpose.msk.msra.mxu1 %vm1857_vm3, %v1511_v29  ;;  %v1003_v46 = vmax.f32 %v965_v44, 0.0  ;;  %v1447_v47 = vpop.f32.mrb[28].mxu0 }
 0x2be   : > { %1514 = vmatprep.subr.bf16.mxu1 %v1642_v0  ;;  %v980_v48 = vadd.f32 %v1447_v47, %v1250_v4  ;;  %v974_v49 = vpop.f32.mrb[29].mxu0 }
 0x2bf   : > { %v1523_v50 = vpack.c.bf16 %v1004_v45, %v1003_v46  ;;  %v975_v51 = vadd.f32 %v1250_v4, %v974_v49 }
 0x2c0   : > { %v1006_v52 = vmax.f32 %v980_v48, 0.0 }
 0x2c1   : > { %v1005_v53 = vmax.f32 %v975_v51, 0.0  ;;  %v1450_v54 = vpop.f32.mrb[30].mxu0 }
 0x2c2   : > { %v990_v55 = vadd.f32 %v1450_v54, %v1250_v4  ;;  %v984_v56 = vpop.f32.mrb[31].mxu0 }
 0x2c3   : > { %v1527_v57 = vpack.c.bf16 %v1006_v52, %v1005_v53  ;;  %v985_v58 = vadd.f32 %v1250_v4, %v984_v56  ;;  %v1019_v4 = vrot.slane %v1014_v3, %v1018_v2 }
 0x2c4   : > { %v1008_v59 = vmax.f32 %v990_v55, 0.0 }
 0x2c5   : > { %1517 = vmatpush3.bf16.xpose.msk.msra.mxu1 %vm1857_vm3, %v1515_v36  ;;  %v1007_v60 = vmax.f32 %v985_v58, 0.0 }
 0x2c6   : > { %1518 = vmatprep.subr.bf16.mxu1 %v1642_v0 }
 0x2c7   : > { %v1531_v61 = vpack.c.bf16 %v1008_v59, %v1007_v60 }
 0x2cd   : > { %1521 = vmatpush3.bf16.xpose.msk.msra.mxu1 %vm1857_vm3, %v1519_v43 }
 0x2ce   : > { %1522 = vmatprep.subr.bf16.mxu1 %v1642_v0 }
 0x2d5   : > { %1525 = vmatpush3.bf16.xpose.msk.msra.mxu1 %vm1857_vm3, %v1523_v50 }
 0x2d6   : > { %1526 = vmatprep.subr.bf16.mxu1 %v1642_v0 }
 0x2dd   : > { %1529 = vmatpush3.bf16.xpose.msk.msra.mxu1 %vm1857_vm3, %v1527_v57 }
 0x2de   : > { %1530 = vmatprep.subr.bf16.mxu1 %v1642_v0 }
 0x2e5   : > { %1533 = vmatpush3.bf16.xpose.msk.msra.mxu1 %vm1857_vm3, %v1531_v61 }
 0x2ec   : > { %1484 = vmatmul.mubr.msk.f32.vlgmr.msra.gmra.mrb[16].mxu1 %vm579_vm1, %v1009_v62 }
 0x3bf   : > { %v1137_v5 = vpop.f32.mrb[16].mxu1 }
 0x3c0   : > { %v1138_v0 = vadd.f32 %v1137_v5, %v1019_v4  ;;  %v1485_v6 = vpop.f32.mrb[17].mxu1 }
 0x3c2   : > { %1141 = vst [vmem:[%s327_s29] sm:$0x1] %v1138_v0 }
 0x3c3   : > { %1591 = shalt.err (!%p1588_p3)
}
 0x3c4   : > { %s1592_s24 = scalar_lea.hbm %s1893_s15, 16  ;;  %s1596_s28 = scalar_lea.hbm %s1944_s9, 32 }
 0x3c5   : > { %p1593_p4 = scmp.ne.s32.totalorder %s1893_s15, %s1592_s24  ;;  %p1597_p9 = scmp.lt.u32.totalorder %s1893_s15, %s1944_s9 }
 0x3c6   : > { %p1598_p10 = scmp.lt.u32.totalorder %s1596_s28, %s1592_s24  ;;  %p1600_p12 = scmp.lt.u32.totalorder %s1592_s24, %s1893_s15 }
 0x3c7   : > { %p1594_p7 = pnand %p1593_p4, %p1735_p5 }
 0x3c8   : > { %p1599_p11 = por %p1598_p10, %p1597_p9 }
 0x3c9   : > { %p1595_p8 = pneg %p1594_p7 }
 0x3ca   : > { %p1601_p13 = por %p1600_p12, %p1599_p11 }
 0x3cc   : > { %p1602_p0 = pnand %p1601_p13, %p1595_p8 }
 0x3ce   : > { %1605 = shalt.err (!%p1602_p0)
}
 0x3cf   : > { %1534 = dma.vmem_to_hbm [thread:$0]  (%p1735_p5), %s1895_s30, 16, %s1893_s15, %s1143_s17  }
 0x3d0 PF: > { %p1540_p1 = scmp.ge.s32.totalorder %s1640_s14, 2  ;;  %s1167_s8 = sand.u32 1, %s1628_s11  }
 0x3d1   : > { %s1168_s18 = scalar_lea.sflag [#allocation4], %s1167_s8 }
 0x3d2   : > { %p1537_p2 = pnand %p1540_p1, %p1739_p6 }
 0x3d4   : > { %1623 = dma.done.wait (!%p1537_p2), %s1168_s18, 16  }
 0x3d5   : > { %1625 = vsyncadd (!%p1537_p2), %s1168_s18, 4294967280  ;;  %p21_p3 = scmp.ge.s32.totalorder %s1723_s16, 4   ;;  %s1949_s11 = smov %s1632_s12 }
 0x3d6   : > { %s1950_s12 = smov %s1636_s13  ;;  %s1951_s13 = smov %s1733_s19 }
 0x3d7   : > { %s1952_s14 = smov %s1723_s16  ;;  %23 = sbr.rel (!%p21_p3) target bundleno = 6 (0x6), region = 91 }
 0x3de   :  { %1172 = vsyncpa [#allocation4], 1 }
 0x3df   :  { %1174 = vsyncpa [#allocation4 + $0x1], 1 }

</bundles_post_ra>
